<compile_context>
chip_gen: v6e
topology: v6e:2x2x1
jax: 0.10.0
libtpu: 0.0.40
codegen_flags: <defaults>
</compile_context>

<pallas_src>
import functools

import numpy as np

import jax
import jax.numpy as jnp
from jax.experimental import pallas as pl
from jax.experimental.pallas import tpu as pltpu


def _round_up(x, m):
    return ((x + m - 1) // m) * m


def _fourier_kernel(pos_ref, freq_ref, out_ref, *, D, K, concat_pos, sine_only):
    # pos_ref:  [Nb, D]   row block of flattened positions
    # freq_ref: [D, K]    pi * linspace(1, res_d/2, K)  (float32)
    # out_ref:  [Nb, O]
    p = pos_ref[...].astype(jnp.float32)
    f = freq_ref[...]

    # Angles for all spatial dims at once (d-major): [Nb, D*K].
    angles = jnp.concatenate(
        [p[:, d:d + 1] * f[d:d + 1, :] for d in range(D)], axis=-1)

    if sine_only:
        trig = jnp.sin(angles)                                      # [Nb, D*K]
    else:
        # cos(x) == sin(x + pi/2); one sin over the doubled block produces the
        # [sin | cos] layout directly and halves EUP pushes (error ~1e-6 for
        # the angle magnitudes this module produces).
        trig = jnp.sin(jnp.concatenate(
            [angles, angles + jnp.float32(0.5 * np.pi)], axis=-1))  # [Nb, 2*D*K]

    row = jnp.concatenate([p, trig], axis=-1) if concat_pos else trig
    out_ref[...] = row.astype(out_ref.dtype)        # single full-width store


def fourier_position_encoding(pos, num_bands, max_resolution,
                              concat_pos=True, sine_only=False,
                              block_rows=8192):
    """Pallas implementation of FourierPositionEncoding.forward."""
    num_bands = tuple(int(b) for b in num_bands)
    max_resolution = tuple(max_resolution)
    if sum(num_bands) == 0:
        return pos

    squeeze_batch = (pos.ndim == 2)
    if squeeze_batch:
        pos = pos[None]
    B, N, D = pos.shape
    assert D == len(max_resolution) == len(num_bands)
    K = num_bands[0]
    # torch.stack of the per-dim linspaces requires equal band counts.
    assert all(k == K for k in num_bands)

    # Compile-time frequency table, pre-scaled by pi:
    #   freq[d] = pi * linspace(1, res_d / 2, K)
    freq = np.pi * np.stack(
        [np.linspace(1.0, r / 2.0, K) for r in max_resolution], axis=0)
    freq = jnp.asarray(freq, dtype=jnp.float32)                     # [D, K]

    enc = D * K if sine_only else 2 * D * K
    O = enc + (D if concat_pos else 0)

    # Flatten (B, N) -> rows and tile over a row block.
    R = B * N
    pos2 = pos.reshape(R, D)
    Nb = min(block_rows, _round_up(R, 8))
    Nb = _round_up(Nb, 8)            # sublane-aligned block (second-to-last dim)
    grid = (pl.cdiv(R, Nb),)

    kernel = functools.partial(
        _fourier_kernel, D=D, K=K, concat_pos=concat_pos, sine_only=sine_only)

    out = pl.pallas_call(
        kernel,
        out_shape=jax.ShapeDtypeStruct((R, O), pos.dtype),
        grid=grid,
        in_specs=[
            pl.BlockSpec((Nb, D), lambda i: (i, 0)),
            pl.BlockSpec((D, K), lambda i: (0, 0)),   # constant index -> DMA'd once
        ],
        out_specs=pl.BlockSpec((Nb, O), lambda i: (i, 0)),
        compiler_params=pltpu.CompilerParams(
            dimension_semantics=("parallel",)),
    )(pos2, freq)

    out = out.reshape(B, N, O)
    if squeeze_batch:
        out = out[0]
    return out


def _reference(pos, num_bands, max_resolution, concat_pos=True, sine_only=False):
    """Pure-JAX reference mirroring generate_fourier_features (batched case)."""
    B, N, D = pos.shape
    freq = jnp.stack(
        [jnp.linspace(1.0, r / 2.0, k) for r, k in zip(max_resolution, num_bands)],
        axis=0,
    ).astype(pos.dtype)                                     # [D, K]
    per = pos[:, :, :, None] * freq[None, None, :, :]       # [B, N, D, K]
    per = per.reshape(B, N, -1)                             # [B, N, D*K]
    if sine_only:
        per = jnp.sin(jnp.pi * per)
    else:
        per = jnp.concatenate([jnp.sin(jnp.pi * per), jnp.cos(jnp.pi * per)],
                              axis=-1)
    if concat_pos:
        per = jnp.concatenate([pos, per], axis=-1)
    return per


if __name__ == "__main__":
    B, N = 2, 64
    max_resolution = (16, 16)     # 2 spatial dims
    num_bands = (6, 6)            # K = 6 bands per dim
    D = len(max_resolution)

    key = jax.random.PRNGKey(0)
    # Positions in [-1, 1], as produced by ipot's build_linear_positions.
    pos = jax.random.uniform(key, (B, N, D), dtype=jnp.float32,
                             minval=-1.0, maxval=1.0)

    out = fourier_position_encoding(pos, num_bands, max_resolution,
                                    concat_pos=True, sine_only=False)
    out = jax.block_until_ready(out)

    ref = _reference(pos, num_bands, max_resolution,
                     concat_pos=True, sine_only=False)

    expected_O = D + 2 * D * num_bands[0]
    assert out.shape == (B, N, expected_O), out.shape
    assert jnp.allclose(out, ref, atol=1e-5, rtol=1e-5)

    # Exercise multi-step row tiling (grid > 1) and the un-batched 2-D path.
    out_tiled = fourier_position_encoding(pos, num_bands, max_resolution,
                                          block_rows=32)
    out_tiled = jax.block_until_ready(out_tiled)
    assert jnp.allclose(out_tiled, ref, atol=1e-5, rtol=1e-5)

    out_2d = fourier_position_encoding(pos[0], num_bands, max_resolution)
    out_2d = jax.block_until_ready(out_2d)
    assert jnp.allclose(out_2d, ref[0], atol=1e-5, rtol=1e-5)

    print("KERNEL_OK")
</pallas_src>

<mosaic_0001>
module attributes {stable_mosaic.version = 11 : i64} {
  func.func @_fourier_kernel(%arg0: i32, %arg1: memref<128x2xf32, #tpu.memory_space<vmem>>, %arg2: memref<2x6xf32, #tpu.memory_space<vmem>>, %arg3: memref<128x26xf32, #tpu.memory_space<vmem>>) attributes {dimension_semantics = [#tpu.dimension_semantics<parallel>], iteration_bounds = array<i64: 1>, scalar_prefetch = 0 : i64, scratch_operands = 0 : i64, tpu.core_type = #tpu.core_type<tc>, window_params = [{transform_indices = @transform_0, window_bounds = array<i64: 128, 2>}, {pipeline_mode = #tpu.pipeline_mode<synchronous>, transform_indices = @transform_1, window_bounds = array<i64: 2, 6>}, {transform_indices = @transform_2, window_bounds = array<i64: 128, 26>}]} {
    %c0 = arith.constant 0 : index
    %c0_0 = arith.constant 0 : index
    %0 = vector.load %arg1[%c0, %c0_0] : memref<128x2xf32, #tpu.memory_space<vmem>>, vector<128x2xf32>
    %c0_1 = arith.constant 0 : index
    %c0_2 = arith.constant 0 : index
    %1 = vector.load %arg2[%c0_1, %c0_2] : memref<2x6xf32, #tpu.memory_space<vmem>>, vector<2x6xf32>
    %2 = vector.extract_strided_slice %0 {offsets = [0, 0], sizes = [128, 1], strides = [1, 1]} : vector<128x2xf32> to vector<128x1xf32>
    %3 = vector.extract_strided_slice %1 {offsets = [0, 0], sizes = [1, 6], strides = [1, 1]} : vector<2x6xf32> to vector<1x6xf32>
    %4 = vector.broadcast %2 : vector<128x1xf32> to vector<128x6xf32>
    %5 = vector.broadcast %3 : vector<1x6xf32> to vector<128x6xf32>
    %6 = arith.mulf %4, %5 : vector<128x6xf32>
    %7 = vector.extract_strided_slice %0 {offsets = [0, 1], sizes = [128, 1], strides = [1, 1]} : vector<128x2xf32> to vector<128x1xf32>
    %8 = vector.extract_strided_slice %1 {offsets = [1, 0], sizes = [1, 6], strides = [1, 1]} : vector<2x6xf32> to vector<1x6xf32>
    %9 = vector.broadcast %7 : vector<128x1xf32> to vector<128x6xf32>
    %10 = vector.broadcast %8 : vector<1x6xf32> to vector<128x6xf32>
    %11 = arith.mulf %9, %10 : vector<128x6xf32>
    %12 = tpu.concatenate %6, %11 in 1 : vector<128x6xf32>, vector<128x6xf32> -> vector<128x12xf32>
    %cst = arith.constant 1.57079637 : f32
    %13 = vector.broadcast %cst : f32 to vector<128x12xf32>
    %14 = arith.addf %12, %13 : vector<128x12xf32>
    %15 = tpu.concatenate %12, %14 in 1 : vector<128x12xf32>, vector<128x12xf32> -> vector<128x24xf32>
    %16 = math.sin %15 : vector<128x24xf32>
    %17 = tpu.concatenate %0, %16 in 1 : vector<128x2xf32>, vector<128x24xf32> -> vector<128x26xf32>
    %c0_3 = arith.constant 0 : index
    %c0_4 = arith.constant 0 : index
    %18 = vector.load %arg3[%c0_3, %c0_4] : memref<128x26xf32, #tpu.memory_space<vmem>>, vector<128x26xf32>
    tpu.vector_store %arg3[%c0_3, %c0_4], %17 {strides = array<i32>} : memref<128x26xf32, #tpu.memory_space<vmem>>, vector<128x26xf32>,
    return
  }
  func.func @transform_0(%arg0: i32) -> (i32, i32) {
    %c0_i32 = arith.constant 0 : i32
    %c0_i32_0 = arith.constant 0 : i32
    return %arg0, %c0_i32 : i32, i32
  }
  func.func @transform_1(%arg0: i32) -> (i32, i32) {
    %c0_i32 = arith.constant 0 : i32
    %c0_i32_0 = arith.constant 0 : i32
    %c0_i32_1 = arith.constant 0 : i32
    return %c0_i32, %c0_i32_0 : i32, i32
  }
  func.func @transform_2(%arg0: i32) -> (i32, i32) {
    %c0_i32 = arith.constant 0 : i32
    %c0_i32_0 = arith.constant 0 : i32
    return %arg0, %c0_i32 : i32, i32
  }
}

</mosaic_0001>

<bundles_post_ra>
// kernel: tpu_custom_call.1
= control target key start
LH: loop header
LB: loop body
LE: loop exit
PB: predicated region body
PF: predicated region fallthrough
CT: control target
= control target key end

     0   :  { %v2380_v0 = vmov 1   ;;  %v108_v15 = vlaneseq  ;;  %v2381_v21 = vmov 0   ;;  %vm276_vm0 = vcmask 48128   ;;  %s2383_s15 = smov 12   ;;  %s2390_s16 = smov 2   ;;  %s4214_s0 = inlined_call_operand.vmem [shape: f32[128,2], index: 0, kind: input, shape index: {}]   ;;  %s4215_s1 = inlined_call_operand.vmem [shape: f32[2,6], index: 1, kind: input, shape index: {}]   ;;  %s4216_s2 = inlined_call_operand.vmem [shape: f32[128,26], index: 2, kind: output, shape index: {}]  }
   0x1   :  { %2296 = vset.pattern.permute.xlu1 %v2380_v0  ;;  %2295 = vset.pattern.permute.xlu0 %v2380_v0  ;;  %v13_v1 = vld [vmem:[%s4214_s0 + $0x10] sm:$0xff]  ;;  %v11_v2 = vld [vmem:[%s4214_s0] sm:$0xff]  ;;  %v14_v3 = vld [vmem:[%s4214_s0 + $0x18] sm:$0xff]  ;;  %vm4263_vm1 = vcmask 97280  }
   0x2   :  { %137 = vperm.xlu1 %2296, %v13_v1   ;;  %129 = vperm.xlu0 %2295, %v11_v2   ;;  %v12_v4 = vld [vmem:[%s4214_s0 + $0x8] sm:$0xff]  ;;  %v15_v6 = vld [vmem:[%s4214_s0 + $0x20] sm:$0xff]  ;;  %v18_v7 = vld [vmem:[%s4214_s0 + $0x38] sm:$0xff]  ;;  %v109_v18 = vshrl.u32 %v108_v15, 7 }
   0x3   :  { %v16_v5 = vld [vmem:[%s4214_s0 + $0x28] sm:$0xff]  ;;  %v17_v8 = vld [vmem:[%s4214_s0 + $0x30] sm:$0xff]  ;;  %v19_v10 = vld [vmem:[%s4214_s0 + $0x40] sm:$0xff] }
   0x4   :  { %v20_v9 = vld [vmem:[%s4214_s0 + $0x48] sm:$0xff]  ;;  %v22_v11 = vld [vmem:[%s4214_s0 + $0x58] sm:$0xff]  ;;  %v21_v12 = vld [vmem:[%s4214_s0 + $0x50] sm:$0xff]  ;;  %v110_v19 = vsub.s32 0, %v109_v18  ;;  %v194_v23 = vsub.s32 1, %v109_v18 }
   0x5   :  { %v24_v13 = vld [vmem:[%s4214_s0 + $0x68] sm:$0xff]  ;;  %v23_v14 = vld [vmem:[%s4214_s0 + $0x60] sm:$0xff]  ;;  %v26_v16 = vld [vmem:[%s4214_s0 + $0x78] sm:$0xff] }
   0x6   :  { %141 = vperm.xlu1 %2296, %v14_v3   ;;  %133 = vperm.xlu0 %2295, %v12_v4   ;;  %v25_v17 = vld [vmem:[%s4214_s0 + $0x70] sm:$0xff]  ;;  %v27_v20 = vld [vmem:[%s4215_s1] sm:$0x3]  ;;  %s2382_s1 = smov 6  }
   0x7   :  { %v2457_v22 = vrot.slane %v27_v20, %v110_v19  ;;  %v195_v24 = vrot.slane %v27_v20, %v194_v23 }
   0xa   :  { %149 = vperm.xlu1 %2296, %v16_v5   ;;  %145 = vperm.xlu0 %2295, %v15_v6  }
   0xe   :  { %157 = vperm.xlu1 %2296, %v18_v7   ;;  %153 = vperm.xlu0 %2295, %v17_v8  }
  0x12   :  { %165 = vperm.xlu1 %2296, %v20_v9   ;;  %161 = vperm.xlu0 %2295, %v19_v10  }
  0x16   :  { %173 = vperm.xlu1 %2296, %v22_v11   ;;  %169 = vperm.xlu0 %2295, %v21_v12  }
  0x1a   :  { %181 = vperm.xlu1 %2296, %v24_v13   ;;  %177 = vperm.xlu0 %2295, %v23_v14  }
  0x1e   :  { %189 = vperm.xlu1 %2296, %v26_v16   ;;  %185 = vperm.xlu0 %2295, %v25_v17  }
  0x22   :  { %2298 = vset.pattern.permute.xlu1 %v2381_v21  ;;  %2297 = vset.pattern.permute.xlu0 %v2381_v21 }
  0x23   :  { %35 = vperm.xlu1 %2298, %v12_v4   ;;  %30 = vperm.xlu0 %2297, %v11_v2  }
  0x27   :  { %40 = vperm.xlu1 %2298, %v13_v1   ;;  %45 = vperm.xlu0 %2297, %v14_v3  }
  0x2b   :  { %50 = vperm.xlu1 %2298, %v15_v6   ;;  %55 = vperm.xlu0 %2297, %v16_v5  }
  0x2f   :  { %60 = vperm.xlu1 %2298, %v17_v8   ;;  %65 = vperm.xlu0 %2297, %v18_v7  }
  0x33   :  { %70 = vperm.xlu1 %2298, %v19_v10   ;;  %75 = vperm.xlu0 %2297, %v20_v9  }
  0x37   :  { %80 = vperm.xlu1 %2298, %v21_v12   ;;  %85 = vperm.xlu0 %2297, %v22_v11  }
  0x3b   :  { %90 = vperm.xlu1 %2298, %v23_v14   ;;  %95 = vperm.xlu0 %2297, %v24_v13  }
  0x3f   :  { %100 = vperm.xlu1 %2298, %v25_v17   ;;  %105 = vperm.xlu0 %2297, %v26_v16  }
  0x43   :  { %2299 = vset.pattern.permute.xlu0 %v2380_v0 }
  0x7d   :  { %v138_v25 = vpop.permute.xlu1 %137  ;;  %v130_v26 = vpop.permute.xlu0 %129 }
  0x7e   :  { %v196_v27 = vmul.f32 %v195_v24, %v130_v26  ;;  %v198_v28 = vmul.f32 %v195_v24, %v138_v25 }
  0x80   :  { %228 = vrot.lane.b32.xlu1 %v196_v27, %s2382_s1 }
  0x81   :  { %v142_v29 = vpop.permute.xlu1 %141  ;;  %v134_v30 = vpop.permute.xlu0 %133 }
  0x82   :  { %v197_v31 = vmul.f32 %v195_v24, %v134_v30  ;;  %v199_v34 = vmul.f32 %v195_v24, %v142_v29 }
  0x84   :  { %232 = vrot.lane.b32.xlu1 %v198_v28, %s2382_s1  ;;  %230 = vrot.lane.b32.xlu0 %v197_v31, %s2382_s1 }
  0x85   :  { %v150_v32 = vpop.permute.xlu1 %149  ;;  %v146_v33 = vpop.permute.xlu0 %145 }
  0x86   :  { %v200_v35 = vmul.f32 %v195_v24, %v146_v33  ;;  %v201_v38 = vmul.f32 %v195_v24, %v150_v32 }
  0x88   :  { %234 = vrot.lane.b32.xlu0 %v199_v34, %s2382_s1  ;;  %236 = vrot.lane.b32.xlu1 %v200_v35, %s2382_s1 }
  0x89   :  { %v158_v36 = vpop.permute.xlu1 %157  ;;  %v154_v37 = vpop.permute.xlu0 %153 }
  0x8a   :  { %v202_v39 = vmul.f32 %v195_v24, %v154_v37  ;;  %v203_v42 = vmul.f32 %v195_v24, %v158_v36 }
  0x8c   :  { %238 = vrot.lane.b32.xlu0 %v201_v38, %s2382_s1  ;;  %240 = vrot.lane.b32.xlu1 %v202_v39, %s2382_s1 }
  0x8d   :  { %v166_v40 = vpop.permute.xlu1 %165  ;;  %v162_v41 = vpop.permute.xlu0 %161 }
  0x8e   :  { %v204_v43 = vmul.f32 %v195_v24, %v162_v41  ;;  %v205_v46 = vmul.f32 %v195_v24, %v166_v40 }
  0x90   :  { %242 = vrot.lane.b32.xlu0 %v203_v42, %s2382_s1  ;;  %244 = vrot.lane.b32.xlu1 %v204_v43, %s2382_s1 }
  0x91   :  { %v174_v44 = vpop.permute.xlu1 %173  ;;  %v170_v45 = vpop.permute.xlu0 %169 }
  0x92   :  { %v206_v47 = vmul.f32 %v195_v24, %v170_v45  ;;  %v207_v50 = vmul.f32 %v195_v24, %v174_v44 }
  0x94   :  { %246 = vrot.lane.b32.xlu0 %v205_v46, %s2382_s1  ;;  %248 = vrot.lane.b32.xlu1 %v206_v47, %s2382_s1 }
  0x95   :  { %v182_v48 = vpop.permute.xlu1 %181  ;;  %v178_v49 = vpop.permute.xlu0 %177 }
  0x96   :  { %v208_v51 = vmul.f32 %v195_v24, %v178_v49  ;;  %v209_v53 = vmul.f32 %v195_v24, %v182_v48 }
  0x98   :  { %250 = vrot.lane.b32.xlu0 %v207_v50, %s2382_s1  ;;  %252 = vrot.lane.b32.xlu1 %v208_v51, %s2382_s1 }
  0x99   :  { %v186_v52 = vpop.permute.xlu0 %185  ;;  %v190_v55 = vpop.permute.xlu1 %189 }
  0x9a   :  { %v210_v54 = vmul.f32 %v195_v24, %v186_v52  ;;  %v211_v56 = vmul.f32 %v195_v24, %v190_v55 }
  0x9c   :  { %254 = vrot.lane.b32.xlu0 %v209_v53, %s2382_s1  ;;  %256 = vrot.lane.b32.xlu1 %v210_v54, %s2382_s1 }
  0x9e   :  { %v36_v57 = vpop.permute.xlu1 %35  ;;  %v31_v58 = vpop.permute.xlu0 %30 }
  0x9f   :  { %v112_v8 = vmul.f32 %v2457_v22, %v31_v58  ;;  %v113_v13 = vmul.f32 %v2457_v22, %v36_v57 }
  0xa0   :  { %258 = vrot.lane.b32.xlu0 %v211_v56, %s2382_s1 }
  0xa2   :  { %v41_v59 = vpop.permute.xlu1 %40  ;;  %v46_v60 = vpop.permute.xlu0 %45 }
  0xa3   :  { %v114_v14 = vmul.f32 %v2457_v22, %v41_v59  ;;  %v115_v21 = vmul.f32 %v2457_v22, %v46_v60 }
  0xa6   :  { %v51_v61 = vpop.permute.xlu1 %50  ;;  %v56_v62 = vpop.permute.xlu0 %55 }
  0xa7   :  { %v116_v23 = vmul.f32 %v2457_v22, %v51_v61  ;;  %v117_v30 = vmul.f32 %v2457_v22, %v56_v62 }
  0xaa   :  { %v61_v63 = vpop.permute.xlu1 %60  ;;  %v66_v0 = vpop.permute.xlu0 %65 }
  0xab   :  { %v118_v31 = vmul.f32 %v2457_v22, %v61_v63  ;;  %v119_v38 = vmul.f32 %v2457_v22, %v66_v0 }
  0xae   :  { %v71_v1 = vpop.permute.xlu1 %70  ;;  %v76_v2 = vpop.permute.xlu0 %75 }
  0xaf   :  { %v120_v39 = vmul.f32 %v2457_v22, %v71_v1  ;;  %v121_v46 = vmul.f32 %v2457_v22, %v76_v2 }
  0xb2   :  { %v81_v3 = vpop.permute.xlu1 %80  ;;  %v86_v4 = vpop.permute.xlu0 %85 }
  0xb3   :  { %v122_v47 = vmul.f32 %v2457_v22, %v81_v3  ;;  %v123_v54 = vmul.f32 %v2457_v22, %v86_v4 }
  0xb6   :  { %v91_v5 = vpop.permute.xlu1 %90  ;;  %v2475_v6 = vpop.permute.xlu0 %95 }
  0xb7   :  { %v124_v55 = vmul.f32 %v2457_v22, %v91_v5  ;;  %v125_v62 = vmul.f32 %v2457_v22, %v2475_v6 }
  0xba   :  { %v2477_v7 = vpop.permute.xlu1 %100  ;;  %v2480_v9 = vpop.permute.xlu0 %105 }
  0xbb   :  { %v126_v63 = vmul.f32 %v2457_v22, %v2477_v7  ;;  %v127_v6 = vmul.f32 %v2457_v22, %v2480_v9 }
  0xf2   :  { %v229_v10 = vpop.permute.xlu1 %228 }
  0xf3   :  { %v2483_v11 = vsel %vm276_vm0, %v112_v8, %v229_v10 }
  0xf4   :  { %v293_v12 = vadd.f32 1.5707964, %v2483_v11 }
  0xf6   :  { %v233_v15 = vpop.permute.xlu1 %232  ;;  %325 = vrot.lane.b32.xlu1 %v293_v12, %s2383_s15  ;;  %v231_v16 = vpop.permute.xlu0 %230 }
  0xf7   :  { %v2490_v17 = vsel %vm276_vm0, %v114_v14, %v233_v15  ;;  %v2493_v18 = vsel %vm276_vm0, %v113_v13, %v231_v16 }
  0xf8   :  { %v295_v19 = vadd.f32 1.5707964, %v2490_v17  ;;  %v294_v20 = vadd.f32 1.5707964, %v2493_v18 }
  0xfa   :  { %v237_v24 = vpop.permute.xlu1 %236  ;;  %329 = vrot.lane.b32.xlu1 %v295_v19, %s2383_s15  ;;  %327 = vrot.lane.b32.xlu0 %v294_v20, %s2383_s15  ;;  %v235_v25 = vpop.permute.xlu0 %234 }
  0xfb   :  { %v2502_v26 = vsel %vm276_vm0, %v116_v23, %v237_v24  ;;  %v2505_v27 = vsel %vm276_vm0, %v115_v21, %v235_v25 }
  0xfc   :  { %v297_v28 = vadd.f32 1.5707964, %v2502_v26  ;;  %v296_v29 = vadd.f32 1.5707964, %v2505_v27 }
  0xfe   :  { %v241_v32 = vpop.permute.xlu1 %240  ;;  %333 = vrot.lane.b32.xlu1 %v297_v28, %s2383_s15  ;;  %331 = vrot.lane.b32.xlu0 %v296_v29, %s2383_s15  ;;  %v239_v33 = vpop.permute.xlu0 %238 }
  0xff   :  { %v2514_v34 = vsel %vm276_vm0, %v118_v31, %v241_v32  ;;  %v2517_v35 = vsel %vm276_vm0, %v117_v30, %v239_v33 }
 0x100   :  { %v299_v36 = vadd.f32 1.5707964, %v2514_v34  ;;  %v298_v37 = vadd.f32 1.5707964, %v2517_v35 }
 0x102   :  { %v245_v40 = vpop.permute.xlu1 %244  ;;  %337 = vrot.lane.b32.xlu1 %v299_v36, %s2383_s15  ;;  %335 = vrot.lane.b32.xlu0 %v298_v37, %s2383_s15  ;;  %v243_v41 = vpop.permute.xlu0 %242 }
 0x103   :  { %v2526_v42 = vsel %vm276_vm0, %v120_v39, %v245_v40  ;;  %v2529_v43 = vsel %vm276_vm0, %v119_v38, %v243_v41 }
 0x104   :  { %v301_v44 = vadd.f32 1.5707964, %v2526_v42  ;;  %v300_v45 = vadd.f32 1.5707964, %v2529_v43 }
 0x106   :  { %v249_v48 = vpop.permute.xlu1 %248  ;;  %341 = vrot.lane.b32.xlu1 %v301_v44, %s2383_s15  ;;  %339 = vrot.lane.b32.xlu0 %v300_v45, %s2383_s15  ;;  %v247_v49 = vpop.permute.xlu0 %246 }
 0x107   :  { %v2538_v50 = vsel %vm276_vm0, %v122_v47, %v249_v48  ;;  %v2541_v51 = vsel %vm276_vm0, %v121_v46, %v247_v49  ;;  %v4230_v46 = vmov 683565275   ;;  %v4228_v48 = vmov 2475754826  }
 0x108   :  { %v303_v52 = vadd.f32 1.5707964, %v2538_v50  ;;  %v302_v53 = vadd.f32 1.5707964, %v2541_v51 }
 0x10a   :  { %v253_v56 = vpop.permute.xlu1 %252  ;;  %345 = vrot.lane.b32.xlu1 %v303_v52, %s2383_s15  ;;  %343 = vrot.lane.b32.xlu0 %v302_v53, %s2383_s15  ;;  %v251_v57 = vpop.permute.xlu0 %250  ;;  %v4232_v53 = vmov 2131351028  }
 0x10b   :  { %v2550_v58 = vsel %vm276_vm0, %v124_v55, %v253_v56  ;;  %v2553_v59 = vsel %vm276_vm0, %v123_v54, %v251_v57  ;;  %v4220_v55 = vmov 2102212464   ;;  %v4225_v57 = vmov 920167782  }
 0x10c   :  { %v305_v60 = vadd.f32 1.5707964, %v2550_v58  ;;  %v304_v61 = vadd.f32 1.5707964, %v2553_v59 }
 0x10e   :  { %v257_v0 = vpop.permute.xlu1 %256  ;;  %349 = vrot.lane.b32.xlu1 %v305_v60, %s2383_s15  ;;  %347 = vrot.lane.b32.xlu0 %v304_v61, %s2383_s15  ;;  %v255_v1 = vpop.permute.xlu0 %254 }
 0x10f   :  { %v2564_v2 = vsel %vm276_vm0, %v126_v63, %v257_v0  ;;  %v2567_v3 = vsel %vm276_vm0, %v125_v62, %v255_v1 }
 0x110   :  { %v307_v4 = vadd.f32 1.5707964, %v2564_v2  ;;  %v306_v5 = vadd.f32 1.5707964, %v2567_v3 }
 0x112   :  { %353 = vrot.lane.b32.xlu1 %v307_v4, %s2383_s15  ;;  %351 = vrot.lane.b32.xlu0 %v306_v5, %s2383_s15  ;;  %v259_v7 = vpop.permute.xlu0 %258  ;;  %v4223_v4 = vmov 1326507024  }
 0x113   :  { %v2576_v8 = vsel %vm276_vm0, %v127_v6, %v259_v7 }
 0x114   :  { %v308_v10 = vadd.f32 1.5707964, %v2576_v8 }
 0x116   :  { %355 = vrot.lane.b32.xlu0 %v308_v10, %s2383_s15 }
 0x168   :  { %v326_v12 = vpop.permute.xlu1 %325 }
 0x169   :  { %v2582_v13 = vsel %vm4263_vm1, %v2483_v11, %v326_v12 }
 0x16a   :  { %v390_v22 = vand.u32 2147483647, %v2582_v13  ;;  %v393_v9 = vand.u32 2139095040, %v2582_v13 }
 0x16c   :  { %v394_v14 = vshrl.u32 %v393_v9, 23  ;;  %v397_v15 = vand.u32 8388607, %v390_v22  ;;  %v330_v16 = vpop.permute.xlu1 %329  ;;  %v328_v19 = vpop.permute.xlu0 %327 }
 0x16d   :  { %v2590_v20 = vsel %vm4263_vm1, %v2490_v17, %v330_v16  ;;  %v2594_v21 = vsel %vm4263_vm1, %v2493_v18, %v328_v19 }
 0x16e   :  { %4280 = vst [vmem:[#allocation2_spill] sm:$0xff] %v2590_v20  ;;  %4281 = vst [vmem:[#allocation3_spill] sm:$0xff] %v2594_v21  ;;  %v2156_v11 = vadd.s32 4294967169, %v394_v14  ;;  %v598_v23 = vand.u32 2147483647, %v2590_v20  ;;  %v601_v24 = vand.u32 2139095040, %v2590_v20 }
 0x16f   :  { %v497_v25 = vand.u32 2139095040, %v2594_v21  ;;  %v398_v28 = vor.u32 8388608, %v397_v15  ;;  %v4218_v17 = vand.u32 2147483647, %v2594_v21 }
 0x170   :  { %v400_v29 = vadd.s32 1, %v2156_v11  ;;  %v602_v30 = vshrl.u32 %v601_v24, 23  ;;  %v605_v31 = vand.u32 8388607, %v598_v23 }
 0x171   :  { %v498_v32 = vshrl.u32 %v497_v25, 23  ;;  %v2602_v39 = vshll.u32 %v398_v28, 8  ;;  %v2606_v44 = vand.u32 8388607, %v4218_v17 }
 0x172   :  { %vm401_vm2 = vcmp.gt.s32.totalorder %v400_v29, 0  ;;  %v2164_v18 = vadd.s32 4294967169, %v602_v30  ;;  %v606_v40 = vor.u32 8388608, %v605_v31 }
 0x173   :  { %v402_v33 = vsel %vm401_vm2, %v400_v29, 0  ;;  %v2160_v36 = vadd.s32 4294967169, %v498_v32 }
 0x174   :  { %v403_v37 = vshrl.u32 %v402_v33, 5  ;;  %v404_v38 = vand.u32 31, %v402_v33  ;;  %v608_v41 = vadd.s32 1, %v2164_v18 }
 0x175   :  { %v2610_v52 = vadd.s32 1, %v2160_v36 }
 0x176   :  { %v405_v45 = vsub.s32 32, %v404_v38  ;;  %v407_v47 = vshll.u32 %v4230_v46, %v404_v38  ;;  %v410_v49 = vshll.u32 %v4228_v48, %v404_v38  ;;  %v413_v54 = vshll.u32 %v4232_v53, %v404_v38 }
 0x177   :  { %v416_v56 = vshll.u32 %v4220_v55, %v404_v38  ;;  %v419_v60 = vshll.u32 %v4225_v57, %v404_v38  ;;  %vm422_vm3 = vcmp.lt.s32.totalorder %v403_v37, 1  ;;  %vm423_vm4 = vcmp.lt.s32.totalorder %v403_v37, 2 }
 0x178   :  { %v408_v61 = vshrl.u32 %v4228_v48, %v405_v45  ;;  %v411_v62 = vshrl.u32 %v4232_v53, %v405_v45  ;;  %v414_v63 = vshrl.u32 %v4220_v55, %v405_v45  ;;  %v406_v0 = vshrl.u32 %v4230_v46, %v405_v45 }
 0x179   :  { %v417_v1 = vshrl.u32 %v4225_v57, %v405_v45  ;;  %v420_v5 = vshrl.u32 %v4223_v4, %v405_v45  ;;  %vm424_vm5 = vcmp.lt.s32.totalorder %v403_v37, 3  ;;  %vm609_vm6 = vcmp.gt.s32.totalorder %v608_v41, 0 }
 0x17a   :  { %v409_v6 = vor.u32 %v408_v61, %v407_v47  ;;  %v412_v7 = vor.u32 %v411_v62, %v410_v49  ;;  %v415_v10 = vor.u32 %v414_v63, %v413_v54  ;;  %vm425_vm7 = vcmp.lt.s32.totalorder %v403_v37, 4 }
 0x17b   :  { %v418_v12 = vor.u32 %v417_v1, %v416_v56  ;;  %v421_v9 = vor.u32 %v420_v5, %v419_v60  ;;  %v610_v14 = vsel %vm609_vm6, %v608_v41, 0  ;;  %v2630_v38 = vshll.u32 %v606_v40, 8 }
 0x17c   :  { %v426_v15 = vsel %vm422_vm3, %v406_v0, %v409_v6  ;;  %v427_v16 = vsel %vm425_vm7, %v415_v10, 2102212464  ;;  %v430_v19 = vsel %vm422_vm3, %v409_v6, %v412_v7  ;;  %v434_v11 = vsel %vm422_vm3, %v412_v7, %v415_v10 }
 0x17d   :  { %v428_v24 = vsel %vm424_vm5, %v412_v7, %v427_v16  ;;  %v431_v25 = vsel %vm425_vm7, %v418_v12, 920167782  ;;  %v435_v28 = vsel %vm425_vm7, %v421_v9, 1326507024  ;;  %v611_v29 = vshrl.u32 %v610_v14, 5 }
 0x17e   :  { %v429_v30 = vsel %vm423_vm4, %v426_v15, %v428_v24  ;;  %v432_v31 = vsel %vm424_vm5, %v415_v10, %v431_v25  ;;  %v436_v32 = vsel %vm424_vm5, %v418_v12, %v435_v28  ;;  %v612_v33 = vand.u32 31, %v610_v14 }
 0x17f   :  { %v433_v18 = vsel %vm423_vm4, %v430_v19, %v432_v31  ;;  %v437_v36 = vsel %vm423_vm4, %v434_v11, %v436_v32  ;;  %vm505_vm8 = vcmp.gt.s32.totalorder %v2610_v52, 0  ;;  %v445_v54 = vmul.u32 %v2602_v39, %v429_v30 }
 0x180   :  { %v2634_v41 = vmul.u32.u64.low %v2602_v39, %v437_v36  ;;  %v2635_v45 = vmul.u32.u64.high %v2602_v39, %v437_v36, %v2634_v41  ;;  %v2638_v47 = vmul.u32.u64.low %v2602_v39, %v433_v18  ;;  %v2639_v49 = vmul.u32.u64.high %v2602_v39, %v433_v18, %v2638_v47 }
 0x181   :  { %v613_v56 = vsub.s32 32, %v612_v33  ;;  %v615_v60 = vshll.u32 %v4230_v46, %v612_v33  ;;  %vm630_vm9 = vcmp.lt.s32.totalorder %v611_v29, 1  ;;  %v618_v37 = vshll.u32 %v4228_v48, %v612_v33 }
 0x182   :  { %v621_v40 = vshll.u32 %v4232_v53, %v612_v33  ;;  %v624_v61 = vshll.u32 %v4220_v55, %v612_v33  ;;  %v627_v62 = vshll.u32 %v4225_v57, %v612_v33  ;;  %vm631_vm10 = vcmp.lt.s32.totalorder %v611_v29, 2 }
 0x183   :  { %v616_v63 = vshrl.u32 %v4228_v48, %v613_v56  ;;  %v619_v0 = vshrl.u32 %v4232_v53, %v613_v56  ;;  %v622_v1 = vshrl.u32 %v4220_v55, %v613_v56  ;;  %vm447_vm11 = vc.u32 %v2635_v45, %v2638_v47 }
 0x184   :  { %v448_v39 = vadd.s32 1, %v2639_v49  ;;  %v614_v5 = vshrl.u32 %v4230_v46, %v613_v56  ;;  %v625_v6 = vshrl.u32 %v4225_v57, %v613_v56  ;;  %v628_v9 = vshrl.u32 %v4223_v4, %v613_v56 }
 0x185   :  { %v617_v7 = vor.u32 %v616_v63, %v615_v60  ;;  %v620_v10 = vor.u32 %v619_v0, %v618_v37  ;;  %v623_v12 = vor.u32 %v622_v1, %v621_v40  ;;  %vm632_vm12 = vcmp.lt.s32.totalorder %v611_v29, 3  ;;  %v334_v60 = vpop.permute.xlu1 %333 }
 0x186   :  { %v449_v14 = vsel %vm447_vm11, %v448_v39, %v2639_v49  ;;  %v626_v15 = vor.u32 %v625_v6, %v624_v61  ;;  %vm633_vm13 = vcmp.lt.s32.totalorder %v611_v29, 4  ;;  %v629_v19 = vor.u32 %v628_v9, %v627_v62 }
 0x187   :  { %v450_v16 = vadd.s32 %v449_v14, %v445_v54  ;;  %v634_v11 = vsel %vm630_vm9, %v614_v5, %v617_v7  ;;  %v635_v24 = vsel %vm633_vm13, %v623_v12, 2102212464  ;;  %v638_v28 = vsel %vm630_vm9, %v617_v7, %v620_v10 }
 0x188   :  { %v636_v25 = vsel %vm632_vm12, %v620_v10, %v635_v24  ;;  %v639_v30 = vsel %vm633_vm13, %v626_v15, 920167782  ;;  %v642_v31 = vsel %vm630_vm9, %v620_v10, %v623_v12  ;;  %v643_v18 = vsel %vm633_vm13, %v629_v19, 1326507024 }
 0x189   :  { %v451_v32 = vadd.s32 536870912, %v450_v16  ;;  %v640_v33 = vsel %vm632_vm12, %v623_v12, %v639_v30  ;;  %v506_v36 = vsel %vm505_vm8, %v2610_v52, 0  ;;  %v637_v41 = vsel %vm631_vm10, %v634_v11, %v636_v25 }
 0x18a   :  { %v641_v49 = vsel %vm631_vm10, %v638_v28, %v640_v33  ;;  %v644_v54 = vsel %vm632_vm12, %v626_v15, %v643_v18  ;;  %v502_v56 = vor.u32 8388608, %v2606_v44  ;;  %v508_v0 = vand.u32 31, %v506_v36 }
 0x18b   :  { %v2670_v37 = vshrl.u32 %v451_v32, 30  ;;  %v645_v40 = vsel %vm631_vm10, %v642_v31, %v644_v54  ;;  %v2674_v61 = vmul.u32.u64.low %v2630_v38, %v641_v49  ;;  %v2675_v62 = vmul.u32.u64.high %v2630_v38, %v641_v49, %v2674_v61 }
 0x18c   :  { %v2679_v52 = vmul.u32.u64.low %v2630_v38, %v645_v40  ;;  %v2680_v63 = vmul.u32.u64.high %v2630_v38, %v645_v40, %v2679_v52  ;;  %v2685_v44 = vsel %vm4263_vm1, %v2502_v26, %v334_v60  ;;  %v653_v39 = vmul.u32 %v2630_v38, %v637_v41 }
 0x18d   :  { %v453_v1 = vshll.u32 %v2670_v37, 30  ;;  %4282 = vst [vmem:[#allocation4_spill] sm:$0xff] %v2685_v44  ;;  %v507_v29 = vshrl.u32 %v506_v36, 5  ;;  %v509_v5 = vsub.s32 32, %v508_v0  ;;  %v2688_v6 = vshll.u32 %v502_v56, 8 }
 0x18e   :  { %v656_v10 = vadd.s32 1, %v2675_v62  ;;  %v511_v12 = vshll.u32 %v4230_v46, %v508_v0  ;;  %v514_v9 = vshll.u32 %v4228_v48, %v508_v0  ;;  %vm655_vm14 = vc.u32 %v2680_v63, %v2674_v61 }
 0x18f   :  { %v2690_v7 = vsub.s32 %v450_v16, %v453_v1  ;;  %v512_v26 = vshrl.u32 %v4228_v48, %v509_v5  ;;  %v517_v14 = vshll.u32 %v4232_v53, %v508_v0  ;;  %v520_v38 = vshll.u32 %v4220_v55, %v508_v0 }
 0x190   :  { %v657_v16 = vsel %vm655_vm14, %v656_v10, %v2675_v62  ;;  %v515_v19 = vshrl.u32 %v4232_v53, %v509_v5  ;;  %v518_v11 = vshrl.u32 %v4220_v55, %v509_v5  ;;  %v521_v28 = vshrl.u32 %v4225_v57, %v509_v5 }
 0x191   :  { %v456_v15 = vsub.s32 0, %v2690_v7  ;;  %v658_v24 = vadd.s32 %v657_v16, %v653_v39  ;;  %v513_v25 = vor.u32 %v512_v26, %v511_v12  ;;  %v523_v30 = vshll.u32 %v4225_v57, %v508_v0 }
 0x192   :  { %v516_v32 = vor.u32 %v515_v19, %v514_v9  ;;  %v519_v33 = vor.u32 %v518_v11, %v517_v14  ;;  %v524_v18 = vshrl.u32 %v4223_v4, %v509_v5  ;;  %v522_v41 = vor.u32 %v521_v28, %v520_v38 }
 0x193   :  { %v2157_v31 = vmin.u32 %v456_v15, %v2690_v7  ;;  %v659_v36 = vadd.s32 536870912, %v658_v24  ;;  %vm526_vm15 = vcmp.lt.s32.totalorder %v507_v29, 1  ;;  %vm527_vm0 = vcmp.lt.s32.totalorder %v507_v29, 2 }
 0x194   :  { %v525_v54 = vor.u32 %v524_v18, %v523_v30  ;;  %vm529_vm2 = vcmp.lt.s32.totalorder %v507_v29, 4  ;;  %v534_v56 = vsel %vm526_vm15, %v513_v25, %v516_v32  ;;  %vm528_vm3 = vcmp.lt.s32.totalorder %v507_v29, 3 }
 0x195   :  { %v458_v49 = vclz %v2157_v31  ;;  %v2709_v60 = vshrl.u32 %v659_v36, 30  ;;  %v535_v40 = vsel %vm529_vm2, %v522_v41, 920167782  ;;  %v538_v62 = vsel %vm526_vm15, %v516_v32, %v519_v33 }
 0x196   :  { %v531_v0 = vsel %vm529_vm2, %v519_v33, 2102212464  ;;  %v536_v1 = vsel %vm528_vm3, %v519_v33, %v535_v40  ;;  %v539_v39 = vsel %vm529_vm2, %v525_v54, 1326507024  ;;  %v510_v12 = vshrl.u32 %v4230_v46, %v509_v5 }
 0x197   :  { %v2158_v52 = vadd.s32 4294967294, %v458_v49  ;;  %v661_v10 = vshll.u32 %v2709_v60, 30  ;;  %v537_v9 = vsel %vm527_vm0, %v534_v56, %v536_v1  ;;  %v540_v26 = vsel %vm528_vm3, %v522_v41, %v539_v39 }
 0x198   :  { %v541_v14 = vsel %vm527_vm0, %v538_v62, %v540_v26  ;;  %v2719_v38 = vmul.u32.u64.low %v2688_v6, %v537_v9  ;;  %v2720_v15 = vmul.u32.u64.high %v2688_v6, %v537_v9, %v2719_v38  ;;  %v530_v11 = vsel %vm526_vm15, %v510_v12, %v513_v25 }
 0x199   :  { %vm2159_vm4 = vcmp.lt.s32.totalorder %v2158_v52, 0  ;;  %v2723_v19 = vsub.s32 %v658_v24, %v661_v10  ;;  %v532_v28 = vsel %vm528_vm3, %v516_v32, %v531_v0  ;;  %v809_v18 = vand.u32 2139095040, %v2685_v44 }
 0x19a   :  { %v461_v16 = vsel %vm2159_vm4, 0, %v2158_v52  ;;  %v2729_v31 = vmul.u32.u64.low %v2688_v6, %v541_v14  ;;  %v2730_v33 = vmul.u32.u64.high %v2688_v6, %v541_v14, %v2729_v31  ;;  %v533_v36 = vsel %vm527_vm0, %v530_v11, %v532_v28  ;;  %v332_v52 = vpop.permute.xlu0 %331 }
 0x19b   :  { %v466_v5 = vsub.s32 4294967266, %v461_v16  ;;  %v664_v30 = vsub.s32 0, %v2723_v19  ;;  %v552_v41 = vadd.s32 1, %v2720_v15  ;;  %v462_v49 = vsub.s32 32, %v461_v16 }
 0x19c   :  { %v810_v54 = vshrl.u32 %v809_v18, 23  ;;  %v446_v25 = vadd.s32 %v2638_v47, %v2635_v45  ;;  %v549_v40 = vmul.u32 %v2688_v6, %v533_v36  ;;  %vm551_vm5 = vc.u32 %v2730_v33, %v2719_v38 }
 0x19d   :  { %v2165_v24 = vmin.u32 %v664_v30, %v2723_v19  ;;  %v467_v32 = vadd.s32 127, %v466_v5  ;;  %v553_v29 = vsel %vm551_vm5, %v552_v41, %v2720_v15  ;;  %v4217_v0 = vand.u32 2147483647, %v2685_v44 }
 0x19e   :  { %v2172_v62 = vadd.s32 4294967169, %v810_v54  ;;  %v464_v1 = vshrl.u32 %v446_v25, %v462_v49  ;;  %v554_v10 = vadd.s32 %v553_v29, %v549_v40  ;;  %v2745_v45 = vsel %vm4263_vm1, %v2505_v27, %v332_v52 }
 0x19f   :  { %v666_v56 = vclz %v2165_v24  ;;  %v468_v9 = vshll.u32 %v467_v32, 23  ;;  %4283 = vst [vmem:[#allocation5_spill] sm:$0xff] %v2745_v45  ;;  %v463_v47 = vshll.u32 %v2690_v7, %v461_v16  ;;  %v813_v5 = vand.u32 8388607, %v4217_v0 }
 0x1a0   :  { %v816_v12 = vadd.s32 1, %v2172_v62  ;;  %v555_v6 = vadd.s32 536870912, %v554_v10  ;;  %v705_v18 = vand.u32 2139095040, %v2745_v45  ;;  %v654_v7 = vadd.s32 %v2674_v61, %v2680_v63 }
 0x1a1   :  { %v2166_v39 = vadd.s32 4294967294, %v666_v56  ;;  %v465_v11 = vor.u32 %v464_v1, %v463_v47  ;;  %v469_v30 = vor.u32 4788187, %v468_v9  ;;  %v814_v54 = vor.u32 8388608, %v813_v5 }
 0x1a2   :  { %vm817_vm7 = vcmp.gt.s32.totalorder %v816_v12, 0  ;;  %v2748_v28 = vshrl.u32 %v555_v6, 30  ;;  %v4219_v25 = vand.u32 2147483647, %v2745_v45  ;;  %v706_v62 = vshrl.u32 %v705_v18, 23 }
 0x1a3   :  { %vm2167_vm6 = vcmp.lt.s32.totalorder %v2166_v39, 0  ;;  %v818_v14 = vsel %vm817_vm7, %v816_v12, 0  ;;  %v472_v49 = vcvt.s32.f32 %v465_v11  ;;  %v470_v32 = vand.u32 2147483647, %v469_v30 }
 0x1a4   :  { %v669_v26 = vsel %vm2167_vm6, 0, %v2166_v39  ;;  %v820_v31 = vand.u32 31, %v818_v14  ;;  %v557_v36 = vshll.u32 %v2748_v28, 30  ;;  %v819_v1 = vshrl.u32 %v818_v14, 5 }
 0x1a5   :  { %v674_v15 = vsub.s32 4294967266, %v669_v26  ;;  %v670_v27 = vsub.s32 32, %v669_v26  ;;  %v671_v56 = vshll.u32 %v2723_v19, %v669_v26  ;;  %vm392_vm8 = vcmp.lt.s32.totalorder %v2582_v13, 0 }
 0x1a6   :  { %v821_v41 = vsub.s32 32, %v820_v31  ;;  %v2756_v24 = vsub.s32 %v554_v10, %v557_v36  ;;  %v823_v61 = vshll.u32 %v4230_v46, %v820_v31  ;;  %v826_v39 = vshll.u32 %v4228_v48, %v820_v31 }
 0x1a7   :  { %v675_v16 = vadd.s32 127, %v674_v15  ;;  %v672_v52 = vshrl.u32 %v654_v7, %v670_v27  ;;  %v829_v19 = vshll.u32 %v4232_v53, %v820_v31  ;;  %v832_v47 = vshll.u32 %v4220_v55, %v820_v31 }
 0x1a8   :  { %v824_v40 = vshrl.u32 %v4228_v48, %v821_v41  ;;  %v560_v29 = vsub.s32 0, %v2756_v24  ;;  %v827_v10 = vshrl.u32 %v4232_v53, %v821_v41  ;;  %v830_v12 = vshrl.u32 %v4220_v55, %v821_v41 }
 0x1a9   :  { %v676_v63 = vshll.u32 %v675_v16, 23  ;;  %v833_v6 = vshrl.u32 %v4225_v57, %v821_v41  ;;  %v835_v14 = vshll.u32 %v4225_v57, %v820_v31  ;;  %v836_v15 = vshrl.u32 %v4223_v4, %v821_v41 }
 0x1aa   :  { %v2161_v9 = vmin.u32 %v560_v29, %v2756_v24  ;;  %v825_v26 = vor.u32 %v824_v40, %v823_v61  ;;  %v828_v11 = vor.u32 %v827_v10, %v826_v39  ;;  %v831_v30 = vor.u32 %v830_v12, %v829_v19 }
 0x1ab   :  { %v834_v18 = vor.u32 %v833_v6, %v832_v47  ;;  %v854_v27 = vshll.u32 %v814_v54, 8  ;;  %v473_v36 = vmul.f32 %v472_v49, %v470_v32  ;;  %v673_v7 = vor.u32 %v672_v52, %v671_v56 }
 0x1ac   :  { %v562_v5 = vclz %v2161_v9  ;;  %v837_v16 = vor.u32 %v836_v15, %v835_v14  ;;  %v2168_v29 = vadd.s32 4294967169, %v706_v62  ;;  %v677_v0 = vor.u32 4788187, %v676_v63 }
 0x1ad   :  { %vm838_vm9 = vcmp.lt.s32.totalorder %v819_v1, 1  ;;  %vm841_vm10 = vcmp.lt.s32.totalorder %v819_v1, 4  ;;  %v822_v40 = vshrl.u32 %v4230_v46, %v821_v41  ;;  %vm840_vm11 = vcmp.lt.s32.totalorder %v819_v1, 3 }
 0x1ae   :  { %v2162_v17 = vadd.s32 4294967294, %v562_v5  ;;  %v846_v31 = vsel %vm838_vm9, %v825_v26, %v828_v11  ;;  %v847_v61 = vsel %vm841_vm10, %v834_v18, 920167782  ;;  %vm839_vm13 = vcmp.lt.s32.totalorder %v819_v1, 2 }
 0x1af   :  { %v843_v39 = vsel %vm841_vm10, %v831_v30, 2102212464  ;;  %v848_v49 = vsel %vm840_vm11, %v831_v30, %v847_v61  ;;  %v850_v56 = vsel %vm838_vm9, %v828_v11, %v831_v30  ;;  %v851_v62 = vsel %vm841_vm10, %v837_v16, 1326507024 }
 0x1b0   :  { %vm2163_vm12 = vcmp.lt.s32.totalorder %v2162_v17, 0  ;;  %v849_v32 = vsel %vm839_vm13, %v846_v31, %v848_v49  ;;  %v474_v52 = vxor.u32 2147483648, %v473_v36  ;;  %v678_v63 = vand.u32 2147483647, %v677_v0 }
 0x1b1   :  { %v2776_v54 = vsel %vm2163_vm12, 0, %v2162_v17  ;;  %v842_v10 = vsel %vm838_vm9, %v822_v40, %v825_v26  ;;  %v844_v12 = vsel %vm840_vm11, %v828_v11, %v843_v39  ;;  %v852_v9 = vsel %vm840_vm11, %v834_v18, %v851_v62  ;;  %v338_v17 = vpop.permute.xlu1 %337 }
 0x1b2   :  { %v570_v41 = vsub.s32 4294967266, %v2776_v54  ;;  %v2784_v19 = vmul.u32.u64.low %v854_v27, %v849_v32  ;;  %v2785_v47 = vmul.u32.u64.high %v854_v27, %v849_v32, %v2784_v19  ;;  %v476_v6 = vsub.s32 4, %v2670_v37 }
 0x1b3   :  { %v680_v14 = vcvt.s32.f32 %v673_v7  ;;  %v853_v5 = vsel %vm839_vm13, %v850_v56, %v852_v9  ;;  %vm2792_vm14 = vcmp.le.f32.partialorder %v390_v22, 0.7853982  ;;  %v712_v30 = vadd.s32 1, %v2168_v29 }
 0x1b4   :  { %v571_v15 = vadd.s32 127, %v570_v41  ;;  %v2796_v26 = vmul.u32.u64.low %v854_v27, %v853_v5  ;;  %v2797_v11 = vmul.u32.u64.high %v854_v27, %v853_v5, %v2796_v26  ;;  %vm600_vm15 = vcmp.lt.s32.totalorder %v2590_v20, 0 }
 0x1b5   :  { %v681_v18 = vmul.f32 %v680_v14, %v678_v63  ;;  %v845_v16 = vsel %vm839_vm13, %v842_v10, %v844_v12  ;;  %v709_v7 = vand.u32 8388607, %v4219_v25  ;;  %v2805_v40 = vsel %vm4263_vm1, %v2514_v34, %v338_v17 }
 0x1b6   :  { %v475_v22 = vsel %vm392_vm8, %v474_v52, %v473_v36  ;;  %v566_v31 = vsub.s32 32, %v2776_v54  ;;  %v864_v61 = vadd.s32 1, %v2785_v47  ;;  %vm713_vm0 = vcmp.gt.s32.totalorder %v712_v30, 0 }
 0x1b7   :  { %v2814_v1 = vsel %vm392_vm8, %v476_v6, %v2670_v37  ;;  %v550_v29 = vadd.s32 %v2719_v38, %v2730_v33  ;;  %v572_v39 = vshll.u32 %v571_v15, 23  ;;  %v714_v49 = vsel %vm713_vm0, %v712_v30, 0 }
 0x1b8   :  { %v861_v34 = vmul.u32 %v854_v27, %v845_v16  ;;  %vm863_vm2 = vc.u32 %v2797_v11, %v2784_v19  ;;  %v716_v36 = vand.u32 31, %v714_v49  ;;  %v4222_v32 = vand.u32 2147483647, %v2805_v40 }
 0x1b9   :  { %v2824_v56 = vsel %vm2792_vm14, %v2582_v13, %v475_v22  ;;  %v682_v62 = vxor.u32 2147483648, %v681_v18  ;;  %v865_v37 = vsel %vm863_vm2, %v864_v61, %v2785_v47  ;;  %v710_v52 = vor.u32 8388608, %v709_v7 }
 0x1ba   :  { %v568_v63 = vshrl.u32 %v550_v29, %v566_v31  ;;  %v866_v38 = vadd.s32 %v865_v37, %v861_v34  ;;  %v717_v33 = vsub.s32 32, %v716_v36  ;;  %v1017_v27 = vand.u32 2139095040, %v2805_v40 }
 0x1bb   :  { %v573_v41 = vor.u32 4788187, %v572_v39  ;;  %v715_v10 = vshrl.u32 %v714_v49, 5  ;;  %v719_v12 = vshll.u32 %v4230_v46, %v716_v36  ;;  %v722_v9 = vshll.u32 %v4228_v48, %v716_v36 }
 0x1bc   :  { %v867_v17 = vadd.s32 536870912, %v866_v38  ;;  %v720_v6 = vshrl.u32 %v4228_v48, %v717_v33  ;;  %v723_v14 = vshrl.u32 %v4232_v53, %v717_v33  ;;  %v725_v15 = vshll.u32 %v4232_v53, %v716_v36 }
 0x1bd   :  { %v726_v47 = vshrl.u32 %v4220_v55, %v717_v33  ;;  %v728_v5 = vshll.u32 %v4220_v55, %v716_v36  ;;  %v729_v26 = vshrl.u32 %v4225_v57, %v717_v33  ;;  %v732_v30 = vshrl.u32 %v4223_v4, %v717_v33 }
 0x1be   :  { %v683_v16 = vsel %vm600_vm15, %v682_v62, %v681_v18  ;;  %v567_v7 = vshll.u32 %v2756_v24, %v2776_v54  ;;  %v2841_v22 = vshrl.u32 %v867_v17, 30  ;;  %v731_v31 = vshll.u32 %v4225_v57, %v716_v36 }
 0x1bf   :  { %v721_v61 = vor.u32 %v720_v6, %v719_v12  ;;  %v724_v29 = vor.u32 %v723_v14, %v722_v9  ;;  %v727_v39 = vor.u32 %v726_v47, %v725_v15  ;;  %v730_v49 = vor.u32 %v729_v26, %v728_v5 }
 0x1c0   :  { %v569_v34 = vor.u32 %v568_v63, %v567_v7  ;;  %v869_v37 = vshll.u32 %v2841_v22, 30  ;;  %v733_v25 = vor.u32 %v732_v30, %v731_v31  ;;  %v750_v55 = vshll.u32 %v710_v52, 8 }
 0x1c1   :  { %vm2847_vm3 = vcmp.le.f32.partialorder %v598_v23, 0.7853982  ;;  %v574_v24 = vand.u32 2147483647, %v573_v41  ;;  %v718_v54 = vshrl.u32 %v4230_v46, %v717_v33  ;;  %vm737_vm4 = vcmp.lt.s32.totalorder %v715_v10, 4 }
 0x1c2   :  { %v1018_v36 = vshrl.u32 %v1017_v27, 23  ;;  %v2852_v62 = vsub.s32 %v866_v38, %v869_v37  ;;  %vm734_vm5 = vcmp.lt.s32.totalorder %v715_v10, 1  ;;  %vm735_vm6 = vcmp.lt.s32.totalorder %v715_v10, 2 }
 0x1c3   :  { %v739_v63 = vsel %vm737_vm4, %v727_v39, 2102212464  ;;  %vm736_vm7 = vcmp.lt.s32.totalorder %v715_v10, 3  ;;  %v742_v12 = vsel %vm734_vm5, %v721_v61, %v724_v29  ;;  %v743_v9 = vsel %vm737_vm4, %v730_v49, 920167782 }
 0x1c4   :  { %v746_v52 = vsel %vm734_vm5, %v724_v29, %v727_v39  ;;  %v872_v17 = vsub.s32 0, %v2852_v62  ;;  %v738_v23 = vsel %vm734_vm5, %v718_v54, %v721_v61  ;;  %v744_v6 = vsel %vm736_vm7, %v727_v39, %v743_v9 }
 0x1c5   :  { %v747_v14 = vsel %vm737_vm4, %v733_v25, 1326507024  ;;  %v740_v15 = vsel %vm736_vm7, %v724_v29, %v739_v63  ;;  %v745_v41 = vsel %vm735_vm6, %v742_v12, %v744_v6  ;;  %v2180_v47 = vadd.s32 4294967169, %v1018_v36 }
 0x1c6   :  { %v748_v33 = vsel %vm736_vm7, %v730_v49, %v747_v14  ;;  %v2173_v38 = vmin.u32 %v872_v17, %v2852_v62  ;;  %v2858_v5 = vmul.u32.u64.low %v750_v55, %v745_v41  ;;  %v2859_v26 = vmul.u32.u64.high %v750_v55, %v745_v41, %v2858_v5  ;;  %v336_v49 = vpop.permute.xlu0 %335 }
 0x1c7   :  { %v749_v27 = vsel %vm735_vm6, %v746_v52, %v748_v33  ;;  %v576_v30 = vcvt.s32.f32 %v569_v34  ;;  %v1024_v61 = vadd.s32 1, %v2180_v47  ;;  %2300 = vcosq.f32 %v2824_v56 }
 0x1c8   :  { %v2862_v7 = vmul.u32.u64.low %v750_v55, %v749_v27  ;;  %v2863_v31 = vmul.u32.u64.high %v750_v55, %v749_v27, %v2862_v7  ;;  %v874_v25 = vclz %v2173_v38  ;;  %v741_v29 = vsel %vm735_vm6, %v738_v23, %v740_v15 }
 0x1c9   :  { %v1021_v39 = vand.u32 8388607, %v4222_v32  ;;  %2302 = vsinq.f32 %v2824_v56  ;;  %v684_v37 = vsub.s32 4, %v2709_v60  ;;  %v2871_v54 = vmul.f32 %v576_v30, %v574_v24 }
 0x1ca   :  { %vm1025_vm8 = vcmp.gt.s32.totalorder %v1024_v61, 0  ;;  %v2876_v34 = vsel %vm2847_vm3, %v2590_v20, %v683_v16  ;;  %v2174_v36 = vadd.s32 4294967294, %v874_v25  ;;  %v760_v10 = vadd.s32 1, %v2859_v26 }
 0x1cb   :  { %v1026_v63 = vsel %vm1025_vm8, %v1024_v61, 0  ;;  %v757_v12 = vmul.u32 %v750_v55, %v741_v29  ;;  %vm759_vm9 = vc.u32 %v2863_v31, %v2858_v5  ;;  %v2883_v56 = vsel %vm4263_vm1, %v2517_v35, %v336_v49 }
 0x1cc   :  { %v1028_v9 = vand.u32 31, %v1026_v63  ;;  %4288 = vst [vmem:[#allocation6_spill] sm:$0xff] %v2883_v56  ;;  %v862_v24 = vadd.s32 %v2784_v19, %v2797_v11  ;;  %vm2175_vm10 = vcmp.lt.s32.totalorder %v2174_v36, 0  ;;  %v761_v16 = vsel %vm759_vm9, %v760_v10, %v2859_v26 }
 0x1cd   :  { %v1022_v52 = vor.u32 8388608, %v1021_v39  ;;  %v578_v17 = vxor.u32 2147483648, %v2871_v54  ;;  %v877_v23 = vsel %vm2175_vm10, 0, %v2174_v36  ;;  %v762_v6 = vadd.s32 %v761_v16, %v757_v12 }
 0x1ce   :  { %v1029_v55 = vsub.s32 32, %v1028_v9  ;;  %v878_v14 = vsub.s32 32, %v877_v23  ;;  %v882_v15 = vsub.s32 4294967266, %v877_v23  ;;  %v2889_v41 = vshrl.u32 %v1026_v63, 5 }
 0x1cf   :  { %v913_v33 = vand.u32 2139095040, %v2883_v56  ;;  %v763_v35 = vadd.s32 536870912, %v762_v6  ;;  %v1031_v47 = vshll.u32 %v4230_v46, %v1028_v9  ;;  %v1034_v26 = vshll.u32 %v4228_v48, %v1028_v9 }
 0x1d0   :  { %v1032_v19 = vshrl.u32 %v4228_v48, %v1029_v55  ;;  %v1035_v11 = vshrl.u32 %v4232_v53, %v1029_v55  ;;  %v880_v38 = vshrl.u32 %v862_v24, %v878_v14  ;;  %v883_v27 = vadd.s32 127, %v882_v15 }
 0x1d1   :  { %v4289_v30 = vmov 2102212464   ;;  %v879_v61 = vshll.u32 %v2852_v62, %v877_v23  ;;  %v2898_v25 = vshrl.u32 %v763_v35, 30  ;;  %v1037_v39 = vshll.u32 %v4232_v53, %v1028_v9 }
 0x1d2   :  { %v1038_v7 = vshrl.u32 %v4289_v30, %v1029_v55  ;;  %v1033_v29 = vor.u32 %v1032_v19, %v1031_v47  ;;  %v884_v49 = vshll.u32 %v883_v27, 23  ;;  %v1036_v36 = vor.u32 %v1035_v11, %v1034_v26 }
 0x1d3   :  { %v1040_v10 = vshll.u32 %v4289_v30, %v1028_v9  ;;  %v1041_v63 = vshrl.u32 %v4225_v57, %v1029_v55  ;;  %vm496_vm11 = vcmp.lt.s32.totalorder %v2594_v21, 0  ;;  %v765_v12 = vshll.u32 %v2898_v25, 30 }
 0x1d4   :  { %v1039_v24 = vor.u32 %v1038_v7, %v1037_v39  ;;  %v1043_v16 = vshll.u32 %v4225_v57, %v1028_v9  ;;  %v1044_v62 = vshrl.u32 %v4223_v4, %v1029_v55  ;;  %v881_v23 = vor.u32 %v880_v38, %v879_v61  ;;  %v2907_v47 = vpop.eup %2300 }
 0x1d5   :  { %v885_v14 = vor.u32 4788187, %v884_v49  ;;  %v1042_v15 = vor.u32 %v1041_v63, %v1040_v10  ;;  %v1062_v35 = vshll.u32 %v1022_v52, 8  ;;  %v2909_v19 = vsub.s32 %v762_v6, %v765_v12 }
 0x1d6   :  { %v1030_v11 = vshrl.u32 %v4230_v46, %v1029_v55  ;;  %v1045_v27 = vor.u32 %v1044_v62, %v1043_v16  ;;  %v914_v26 = vshrl.u32 %v913_v33, 23  ;;  %v2912_v32 = vpop.eup %2302  ;;  %v4290_v7 = vand.u32 2147483647, %v2594_v21 }
 0x1d7   :  { %v4291_v9 = vmov 0  ;;  %v886_v38 = vand.u32 2147483647, %v885_v14  ;;  %vm1046_vm13 = vcmp.lt.s32.totalorder %v2889_v41, 1  ;;  %vm1048_vm0 = vcmp.lt.s32.totalorder %v2889_v41, 3 }
 0x1d8   :  { %vm2916_vm12 = vcmp.le.f32.partialorder %v4290_v7, 0.7853982  ;;  %vm1049_vm2 = vcmp.lt.s32.totalorder %v2889_v41, 4  ;;  %v768_v52 = vsub.s32 0, %v2909_v19  ;;  %v1054_v55 = vsel %vm1046_vm13, %v1033_v29, %v1036_v36 }
 0x1d9   :  { %v4292_v9 = vsel %vm2916_vm12, 4294967295, %v4291_v9  ;;  %v1051_v6 = vsel %vm1049_vm2, %v1039_v24, 2102212464  ;;  %v1055_v33 = vsel %vm1049_vm2, %v1042_v15, 920167782  ;;  %v888_v61 = vcvt.s32.f32 %v881_v23 }
 0x1da   :  { %4293 = vst [vmem:[#allocation7_spill] sm:$0xff] %v4292_v9  ;;  %vm1047_vm4 = vcmp.lt.s32.totalorder %v2889_v41, 2  ;;  %v1056_v39 = vsel %vm1048_vm0, %v1039_v24, %v1055_v33  ;;  %v1058_v49 = vsel %vm1046_vm13, %v1036_v36, %v1039_v24  ;;  %v2169_v10 = vmin.u32 %v768_v52, %v2909_v19 }
 0x1db   :  { %v1050_v63 = vsel %vm1046_vm13, %v1030_v11, %v1033_v29  ;;  %v1057_v12 = vsel %vm1047_vm4, %v1054_v55, %v1056_v39  ;;  %v1059_v16 = vsel %vm1049_vm2, %v1045_v27, 1326507024  ;;  %v1052_v62 = vsel %vm1048_vm0, %v1036_v36, %v1051_v6 }
 0x1dc   :  { %v1060_v14 = vsel %vm1048_vm0, %v1042_v15, %v1059_v16  ;;  %v2928_v7 = vmul.u32.u64.low %v1062_v35, %v1057_v12  ;;  %v2929_v4 = vmul.u32.u64.high %v1062_v35, %v1057_v12, %v2928_v7  ;;  %vm808_vm5 = vcmp.lt.s32.totalorder %v2685_v44, 0 }
 0x1dd   :  { %v889_v23 = vmul.f32 %v888_v61, %v886_v38  ;;  %v770_v57 = vclz %v2169_v10  ;;  %v1061_v24 = vsel %vm1047_vm4, %v1058_v49, %v1060_v14  ;;  %v2176_v33 = vadd.s32 4294967169, %v914_v26  ;;  %v342_v49 = vpop.permute.xlu1 %341 }
 0x1de   :  { %2304 = vcosq.f32 %v2876_v34  ;;  %v579_v29 = vsel %vm496_vm11, %v578_v17, %v2871_v54  ;;  %v2941_v36 = vmul.u32.u64.low %v1062_v35, %v1061_v24  ;;  %v2942_v15 = vmul.u32.u64.high %v1062_v35, %v1061_v24, %v2941_v36 }
 0x1df   :  { %v2170_v11 = vadd.s32 4294967294, %v770_v57  ;;  %v1053_v27 = vsel %vm1047_vm4, %v1050_v63, %v1052_v62  ;;  %v4227_v38 = vand.u32 2147483647, %v2883_v56  ;;  %v920_v52 = vadd.s32 1, %v2176_v33 }
 0x1e0   :  { %v2952_v26 = vsel %vm600_vm15, %v684_v37, %v2709_v60  ;;  %2306 = vsinq.f32 %v2876_v34  ;;  %v580_v54 = vsub.s32 4, %v2748_v28  ;;  %v1072_v17 = vadd.s32 1, %v2929_v4 }
 0x1e1   :  { %v582_v57 = vsel %vm2916_vm12, %v2594_v21, %v579_v29  ;;  %v890_v41 = vxor.u32 2147483648, %v889_v23  ;;  %vm2171_vm6 = vcmp.lt.s32.totalorder %v2170_v11, 0  ;;  %vm921_vm7 = vcmp.gt.s32.totalorder %v920_v52, 0  ;;  %v346_v20 = vpop.permute.xlu1 %345 }
 0x1e2   :  { %v773_v6 = vsel %vm2171_vm6, 0, %v2170_v11  ;;  %v1069_v55 = vmul.u32 %v1062_v35, %v1053_v27  ;;  %vm1071_vm8 = vc.u32 %v2942_v15, %v2928_v7  ;;  %v922_v60 = vsel %vm921_vm7, %v920_v52, 0 }
 0x1e3   :  { %v774_v37 = vsub.s32 32, %v773_v6  ;;  %v778_v61 = vsub.s32 4294967266, %v773_v6  ;;  %v1073_v34 = vsel %vm1071_vm8, %v1072_v17, %v2929_v4  ;;  %v917_v39 = vand.u32 8388607, %v4227_v38 }
 0x1e4   :  { %v2968_v10 = vsel %vm496_vm11, %v580_v54, %v2748_v28  ;;  %2308 = vcosq.f32 %v582_v57  ;;  %v1074_v63 = vadd.s32 %v1073_v34, %v1069_v55  ;;  %v924_v35 = vand.u32 31, %v922_v60 }
 0x1e5   :  { %2310 = vsinq.f32 %v582_v57  ;;  %v758_v16 = vadd.s32 %v2858_v5, %v2863_v31  ;;  %v779_v62 = vadd.s32 127, %v778_v61  ;;  %v2975_v4 = vsel %vm808_vm5, %v890_v41, %v889_v23 }
 0x1e6   :  { %v1075_v14 = vadd.s32 536870912, %v1074_v63  ;;  %v925_v24 = vsub.s32 32, %v924_v35  ;;  %v2979_v28 = vsel %vm4263_vm1, %v2526_v42, %v342_v49  ;;  %v918_v36 = vor.u32 8388608, %v917_v39 }
 0x1e7   :  { %4294 = vst [vmem:[#allocation8_spill] sm:$0xff] %v2979_v28  ;;  %v776_v33 = vshrl.u32 %v758_v16, %v774_v37  ;;  %v780_v29 = vshll.u32 %v779_v62, 23  ;;  %v927_v11 = vshll.u32 %v4230_v46, %v924_v35  ;;  %v930_v31 = vshll.u32 %v4228_v48, %v924_v35 }
 0x1e8   :  { %v2982_v27 = vshrl.u32 %v1075_v14, 30  ;;  %v928_v5 = vshrl.u32 %v4228_v48, %v925_v24  ;;  %v931_v23 = vshrl.u32 %v4232_v53, %v925_v24  ;;  %v934_v54 = vshrl.u32 %v4289_v30, %v925_v24 }
 0x1e9   :  { %v781_v52 = vor.u32 4788187, %v780_v29  ;;  %v936_v17 = vshll.u32 %v4289_v30, %v924_v35  ;;  %v4295_v42 = vmov 920167782   ;;  %v923_v55 = vshrl.u32 %v922_v60, 5 }
 0x1ea   :  { %v937_v57 = vshrl.u32 %v4295_v42, %v925_v24  ;;  %v1077_v41 = vshll.u32 %v2982_v27, 30  ;;  %v933_v37 = vshll.u32 %v4232_v53, %v924_v35  ;;  %v775_v39 = vshll.u32 %v2909_v19, %v773_v6 }
 0x1eb   :  { %v2993_v34 = vpop.eup %2304  ;;  %v929_v49 = vor.u32 %v928_v5, %v927_v11  ;;  %v932_v16 = vor.u32 %v931_v23, %v930_v31  ;;  %v939_v38 = vshll.u32 %v4295_v42, %v924_v35  ;;  %v4296_v48 = vmov 1326507024  }
 0x1ec   :  { %v938_v62 = vor.u32 %v937_v57, %v936_v17  ;;  %v2996_v14 = vsub.s32 %v1074_v63, %v1077_v41  ;;  %v935_v29 = vor.u32 %v934_v54, %v933_v37  ;;  %v940_v12 = vshrl.u32 %v4296_v48, %v925_v24 }
 0x1ed   :  { %v3000_v46 = vpop.eup %2306  ;;  %v4297_v60 = vand.u32 2147483647, %v2685_v44  ;;  %v4298_v53 = vmov 0  ;;  %v777_v61 = vor.u32 %v776_v33, %v775_v39  ;;  %v782_v19 = vand.u32 2147483647, %v781_v52 }
 0x1ee   :  { %v4301_v6 = vmov 683565275   ;;  %v1225_v63 = vand.u32 2139095040, %v2979_v28  ;;  %v1080_v5 = vsub.s32 0, %v2996_v14  ;;  %v941_v31 = vor.u32 %v940_v12, %v939_v38 }
 0x1ef   :  { %vm3004_vm15 = vcmp.le.f32.partialorder %v4297_v60, 0.7853982  ;;  %v926_v11 = vshrl.u32 %v4301_v6, %v925_v24  ;;  %vm942_vm9 = vcmp.lt.s32.totalorder %v923_v55, 1  ;;  %vm945_vm10 = vcmp.lt.s32.totalorder %v923_v55, 4 }
 0x1f0   :  { %v4299_v53 = vsel %vm3004_vm15, 4294967295, %v4298_v53  ;;  %vm943_vm11 = vcmp.lt.s32.totalorder %v923_v55, 2  ;;  %vm944_vm13 = vcmp.lt.s32.totalorder %v923_v55, 3  ;;  %v950_v35 = vsel %vm942_vm9, %v929_v49, %v932_v16 }
 0x1f1   :  { %4300 = vst [vmem:[#allocation9_spill] sm:$0xff] %v4299_v53  ;;  %v951_v23 = vsel %vm945_vm10, %v938_v62, 920167782  ;;  %v2181_v54 = vmin.u32 %v1080_v5, %v2996_v14  ;;  %v947_v17 = vsel %vm945_vm10, %v935_v29, 2102212464  ;;  %v954_v52 = vsel %vm942_vm9, %v932_v16, %v935_v29  ;;  %v3015_v24 = vpop.eup %2308 }
 0x1f2   :  { %v952_v33 = vsel %vm944_vm13, %v935_v29, %v951_v23  ;;  %4302 = vst [vmem:[#allocation10_spill] sm:$0xff] %v3015_v24  ;;  %v784_v57 = vcvt.s32.f32 %v777_v61  ;;  %v955_v38 = vsel %vm945_vm10, %v941_v31, 1326507024  ;;  %v958_v12 = vshll.u32 %v918_v36, 8  ;;  %v3018_v37 = vpop.eup %2310  ;;  %v340_v23 = vpop.permute.xlu0 %339 }
 0x1f3   :  { %v953_v41 = vsel %vm943_vm11, %v950_v35, %v952_v33  ;;  %4303 = vst [vmem:[#allocation11_spill] sm:$0xff] %v3018_v37  ;;  %vm704_vm0 = vcmp.lt.s32.totalorder %v2745_v45, 0  ;;  %v1082_v39 = vclz %v2181_v54  ;;  %v946_v60 = vsel %vm942_vm9, %v926_v11, %v929_v49 }
 0x1f4   :  { %v956_v5 = vsel %vm944_vm13, %v938_v62, %v955_v38  ;;  %v1226_v21 = vshrl.u32 %v1225_v63, 23  ;;  %v948_v29 = vsel %vm944_vm13, %v932_v16, %v947_v17  ;;  %v785_v36 = vmul.f32 %v784_v57, %v782_v19 }
 0x1f5   :  { %v957_v61 = vsel %vm943_vm11, %v954_v52, %v956_v5  ;;  %v3025_v24 = vmul.u32.u64.low %v958_v12, %v953_v41  ;;  %v3026_v35 = vmul.u32.u64.high %v958_v12, %v953_v41, %v3025_v24  ;;  %v2182_v31 = vadd.s32 4294967294, %v1082_v39 }
 0x1f6   :  { %v3029_v33 = vmul.u32.u64.low %v958_v12, %v957_v61  ;;  %v3030_v37 = vmul.u32.u64.high %v958_v12, %v957_v61, %v3029_v33  ;;  %v4304_v49 = vsub.s32 4, %v2841_v22  ;;  %v2188_v11 = vadd.s32 4294967169, %v1226_v21 }
 0x1f7   :  { %v3041_v16 = vsel %vm4263_vm1, %v2529_v43, %v340_v23  ;;  %v3045_v63 = vsel %vm4263_vm1, %v2538_v50, %v346_v20  ;;  %v3051_v19 = vsel %vm3004_vm15, %v2685_v44, %v2975_v4  ;;  %v788_v54 = vsub.s32 4, %v2898_v25 }
 0x1f8   :  { %v3037_v62 = vsel %vm808_vm5, %v4304_v49, %v2841_v22  ;;  %4306 = vst [vmem:[#allocation13_spill] sm:$0xff] %v3041_v16  ;;  %4307 = vst [vmem:[#allocation14_spill] sm:$0xff] %v3045_v63  ;;  %vm2183_vm2 = vcmp.lt.s32.totalorder %v2182_v31, 0  ;;  %v949_v22 = vsel %vm943_vm11, %v946_v60, %v948_v29  ;;  %v1070_v21 = vadd.s32 %v2928_v7, %v2942_v15 }
 0x1f9   :  { %4305 = vst [vmem:[#allocation12_spill] sm:$0xff] %v3037_v62  ;;  %v1085_v43 = vsel %vm2183_vm2, 0, %v2182_v31  ;;  %v968_v17 = vadd.s32 1, %v3026_v35  ;;  %v1232_v52 = vadd.s32 1, %v2188_v11  ;;  %v786_v50 = vxor.u32 2147483648, %v785_v36 }
 0x1fa   :  { %v1086_v20 = vsub.s32 32, %v1085_v43  ;;  %v1090_v57 = vsub.s32 4294967266, %v1085_v43  ;;  %v4308_v41 = vand.u32 2147483647, %v2979_v28  ;;  %v965_v4 = vmul.u32 %v958_v12, %v949_v22 }
 0x1fb   :  { %vm967_vm4 = vc.u32 %v3030_v37, %v3025_v24  ;;  %vm1233_vm5 = vcmp.gt.s32.totalorder %v1232_v52, 0  ;;  %v1121_v55 = vand.u32 2139095040, %v3041_v16  ;;  %v4309_v39 = vand.u32 2147483647, %v2745_v45 }
 0x1fc   :  { %v1229_v38 = vand.u32 8388607, %v4308_v41  ;;  %v4310_v7 = vmov 0  ;;  %v1088_v15 = vshrl.u32 %v1070_v21, %v1086_v20  ;;  %v1091_v60 = vadd.s32 127, %v1090_v57 }
 0x1fd   :  { %vm3065_vm6 = vcmp.le.f32.partialorder %v4309_v39, 0.7853982  ;;  %v969_v5 = vsel %vm967_vm4, %v968_v17, %v3026_v35  ;;  %v1234_v23 = vsel %vm1233_vm5, %v1232_v52, 0  ;;  %2312 = vcosq.f32 %v3051_v19 }
 0x1fe   :  { %v4311_v7 = vsel %vm3065_vm6, 4294967295, %v4310_v7  ;;  %v3074_v12 = vsel %vm704_vm0, %v788_v54, %v2898_v25  ;;  %v970_v29 = vadd.s32 %v969_v5, %v965_v4  ;;  %v1236_v61 = vand.u32 31, %v1234_v23 }
 0x1ff   :  { %4312 = vst [vmem:[#allocation15_spill] sm:$0xff] %v4311_v7  ;;  %4313 = vst [vmem:[#allocation16_spill] sm:$0xff] %v3074_v12  ;;  %v787_v31 = vsel %vm704_vm0, %v786_v50, %v785_v36  ;;  %v1087_v33 = vshll.u32 %v2996_v14, %v1085_v43  ;;  %v1092_v49 = vshll.u32 %v1091_v60, 23  ;;  %v1230_v35 = vor.u32 8388608, %v1229_v38 }
 0x200   :  { %v971_v22 = vadd.s32 536870912, %v970_v29  ;;  %v1237_v21 = vsub.s32 32, %v1236_v61  ;;  %v1122_v17 = vshrl.u32 %v1121_v55, 23  ;;  %v1235_v57 = vshrl.u32 %v1234_v23, 5 }
 0x201   :  { %v1089_v52 = vor.u32 %v1088_v15, %v1087_v33  ;;  %v1093_v20 = vor.u32 4788187, %v1092_v49  ;;  %v1239_v25 = vshll.u32 %v4301_v6, %v1236_v61  ;;  %v4314_v41 = vmov 2475754826  }
 0x202   :  { %v3081_v54 = vshrl.u32 %v971_v22, 30  ;;  %v1240_v4 = vshrl.u32 %v4314_v41, %v1237_v21  ;;  %v1242_v36 = vshll.u32 %v4314_v41, %v1236_v61  ;;  %v4315_v50 = vmov 2131351028  }
 0x203   :  { %v1243_v14 = vshrl.u32 %v4315_v50, %v1237_v21  ;;  %v1245_v43 = vshll.u32 %v4315_v50, %v1236_v61  ;;  %v1246_v39 = vshrl.u32 %v4289_v30, %v1237_v21  ;;  %v1248_v38 = vshll.u32 %v4289_v30, %v1236_v61 }
 0x204   :  { %v1249_v55 = vshrl.u32 %v4295_v42, %v1237_v21  ;;  %v1094_v15 = vand.u32 2147483647, %v1093_v20  ;;  %v973_v60 = vshll.u32 %v3081_v54, 30  ;;  %v1241_v5 = vor.u32 %v1240_v4, %v1239_v25 }
 0x205   :  { %v1244_v23 = vor.u32 %v1243_v14, %v1242_v36  ;;  %v1247_v33 = vor.u32 %v1246_v39, %v1245_v43  ;;  %v1251_v22 = vshll.u32 %v4295_v42, %v1236_v61  ;;  %v1252_v11 = vshrl.u32 %v4296_v48, %v1237_v21 }
 0x206   :  { %v1250_v49 = vor.u32 %v1249_v55, %v1248_v38  ;;  %v3096_v12 = vsel %vm3065_vm6, %v2745_v45, %v787_v31  ;;  %v3098_v44 = vsub.s32 %v970_v29, %v973_v60  ;;  %v1270_v53 = vshll.u32 %v1230_v35, 8 }
 0x207   :  { %v4316_v20 = vand.u32 2147483647, %v3041_v16  ;;  %v1096_v9 = vcvt.s32.f32 %v1089_v52  ;;  %v1253_v25 = vor.u32 %v1252_v11, %v1251_v22  ;;  %vm1254_vm7 = vcmp.lt.s32.totalorder %v1235_v57, 1 }
 0x208   :  { %v2184_v4 = vadd.s32 4294967169, %v1122_v17  ;;  %v976_v36 = vsub.s32 0, %v3098_v44  ;;  %v1238_v61 = vshrl.u32 %v4301_v6, %v1237_v21  ;;  %vm1257_vm8 = vcmp.lt.s32.totalorder %v1235_v57, 4 }
 0x209   :  { %v1125_v62 = vand.u32 8388607, %v4316_v20  ;;  %v1262_v14 = vsel %vm1254_vm7, %v1241_v5, %v1244_v23  ;;  %vm1016_vm9 = vcmp.lt.s32.totalorder %v2805_v40, 0  ;;  %v1097_v31 = vmul.f32 %v1096_v9, %v1094_v15 }
 0x20a   :  { %vm1256_vm10 = vcmp.lt.s32.totalorder %v1235_v57, 3  ;;  %v1259_v29 = vsel %vm1257_vm8, %v1247_v33, 2102212464  ;;  %v1263_v35 = vsel %vm1257_vm8, %v1250_v49, 920167782  ;;  %v2177_v43 = vmin.u32 %v976_v36, %v3098_v44  ;;  %v3108_v17 = vpop.eup %2312 }
 0x20b   :  { %vm1255_vm11 = vcmp.lt.s32.totalorder %v1235_v57, 2  ;;  %v1264_v52 = vsel %vm1256_vm10, %v1247_v33, %v1263_v35  ;;  %v1266_v11 = vsel %vm1254_vm7, %v1244_v23, %v1247_v33  ;;  %4317 = vst [vmem:[#allocation17_spill] sm:$0xff] %v3108_v17  ;;  %v1258_v39 = vsel %vm1254_vm7, %v1238_v61, %v1241_v5 }
 0x20c   :  { %v1265_v21 = vsel %vm1255_vm11, %v1262_v14, %v1264_v52  ;;  %v1267_v38 = vsel %vm1257_vm8, %v1253_v25, 1326507024  ;;  %v1126_v55 = vor.u32 8388608, %v1125_v62  ;;  %v978_v60 = vclz %v2177_v43 }
 0x20d   :  { %v1260_v22 = vsel %vm1256_vm10, %v1244_v23, %v1259_v29  ;;  %v1268_v9 = vsel %vm1256_vm10, %v1250_v49, %v1267_v38  ;;  %v1128_v15 = vadd.s32 1, %v2184_v4  ;;  %v1098_v20 = vxor.u32 2147483648, %v1097_v31 }
 0x20e   :  { %v1269_v45 = vsel %vm1255_vm11, %v1266_v11, %v1268_v9  ;;  %v3113_v36 = vmul.u32.u64.low %v1270_v53, %v1265_v21  ;;  %v3114_v7 = vmul.u32.u64.high %v1270_v53, %v1265_v21, %v3113_v36  ;;  %v2178_v33 = vadd.s32 4294967294, %v978_v60 }
 0x20f   :  { %v3117_v35 = vmul.u32.u64.low %v1270_v53, %v1269_v45  ;;  %v3118_v17 = vmul.u32.u64.high %v1270_v53, %v1269_v45, %v3117_v35  ;;  %vm1129_vm13 = vcmp.gt.s32.totalorder %v1128_v15, 0  ;;  %2314 = vsinq.f32 %v3051_v19 }
 0x210   :  { %v1261_v5 = vsel %vm1255_vm11, %v1258_v39, %v1260_v22  ;;  %v1130_v23 = vsel %vm1129_vm13, %v1128_v15, 0  ;;  %2316 = vcosq.f32 %v3096_v12  ;;  %vm2179_vm0 = vcmp.lt.s32.totalorder %v2178_v33, 0 }
 0x211   :  { %v1132_v49 = vand.u32 31, %v1130_v23  ;;  %v966_v4 = vadd.s32 %v3025_v24, %v3030_v37  ;;  %v981_v61 = vsel %vm2179_vm0, 0, %v2178_v33  ;;  %v1280_v45 = vadd.s32 1, %v3114_v7 }
 0x212   :  { %v3128_v14 = vshll.u32 %v1126_v55, 8  ;;  %v1099_v19 = vsel %vm1016_vm9, %v1098_v20, %v1097_v31  ;;  %v982_v57 = vsub.s32 32, %v981_v61  ;;  %v986_v29 = vsub.s32 4294967266, %v981_v61 }
 0x213   :  { %v1277_v43 = vmul.u32 %v1270_v53, %v1261_v5  ;;  %v983_v52 = vshll.u32 %v3098_v44, %v981_v61  ;;  %vm1279_vm2 = vc.u32 %v3118_v17, %v3113_v36  ;;  %v1133_v11 = vsub.s32 32, %v1132_v49 }
 0x214   :  { %v1433_v39 = vand.u32 2139095040, %v3045_v63  ;;  %v984_v24 = vshrl.u32 %v966_v4, %v982_v57  ;;  %v987_v37 = vadd.s32 127, %v986_v29  ;;  %v1281_v21 = vsel %vm1279_vm2, %v1280_v45, %v3114_v7 }
 0x215   :  { %v1135_v38 = vshll.u32 %v4301_v6, %v1132_v49  ;;  %v4318_v55 = vand.u32 2147483647, %v2805_v40  ;;  %v4319_v31 = vmov 0  ;;  %v1282_v53 = vadd.s32 %v1281_v21, %v1277_v43 }
 0x216   :  { %v1136_v44 = vshrl.u32 %v4314_v41, %v1133_v11  ;;  %v1138_v60 = vshll.u32 %v4314_v41, %v1132_v49  ;;  %v1139_v22 = vshrl.u32 %v4315_v50, %v1133_v11  ;;  %v985_v9 = vor.u32 %v984_v24, %v983_v52 }
 0x217   :  { %vm3140_vm4 = vcmp.le.f32.partialorder %v4318_v55, 0.7853982  ;;  %v988_v15 = vshll.u32 %v987_v37, 23  ;;  %v1141_v20 = vshll.u32 %v4315_v50, %v1132_v49  ;;  %v1142_v7 = vshrl.u32 %v4289_v30, %v1133_v11 }
 0x218   :  { %v4320_v31 = vsel %vm3140_vm4, 4294967295, %v4319_v31  ;;  %v1283_v33 = vadd.s32 536870912, %v1282_v53  ;;  %v1131_v35 = vshrl.u32 %v1130_v23, 5  ;;  %v1144_v5 = vshll.u32 %v4289_v30, %v1132_v49 }
 0x219   :  { %4321 = vst [vmem:[#allocation18_spill] sm:$0xff] %v4320_v31  ;;  %v1145_v4 = vshrl.u32 %v4295_v42, %v1133_v11  ;;  %v989_v61 = vor.u32 4788187, %v988_v15  ;;  %v1137_v45 = vor.u32 %v1136_v44, %v1135_v38  ;;  %v1140_v57 = vor.u32 %v1139_v22, %v1138_v60 }
 0x21a   :  { %v1143_v29 = vor.u32 %v1142_v7, %v1141_v20  ;;  %v3151_v43 = vshrl.u32 %v1283_v33, 30  ;;  %v1147_v52 = vshll.u32 %v4295_v42, %v1132_v49  ;;  %v1148_v24 = vshrl.u32 %v4296_v48, %v1133_v11 }
 0x21b   :  { %v1146_v21 = vor.u32 %v1145_v4, %v1144_v5  ;;  %v990_v37 = vand.u32 2147483647, %v989_v61  ;;  %v992_v55 = vcvt.s32.f32 %v985_v9  ;;  %v1134_v62 = vshrl.u32 %v4301_v6, %v1133_v11 }
 0x21c   :  { %v1434_v23 = vshrl.u32 %v1433_v39, 23  ;;  %vm912_vm5 = vcmp.lt.s32.totalorder %v2883_v56, 0  ;;  %v1285_v25 = vshll.u32 %v3151_v43, 30  ;;  %v1149_v15 = vor.u32 %v1148_v24, %v1147_v52  ;;  %v3158_v38 = vpop.eup %2314 }
 0x21d   :  { %vm1150_vm7 = vcmp.lt.s32.totalorder %v1131_v35, 1  ;;  %vm1153_vm8 = vcmp.lt.s32.totalorder %v1131_v35, 4  ;;  %v993_v44 = vmul.f32 %v992_v55, %v990_v37  ;;  %vm1152_vm10 = vcmp.lt.s32.totalorder %v1131_v35, 3  ;;  %v3162_v22 = vpop.eup %2316 }
 0x21e   :  { %v1158_v49 = vsel %vm1150_vm7, %v1137_v45, %v1140_v57  ;;  %v1159_v60 = vsel %vm1153_vm8, %v1146_v21, 920167782  ;;  %4322 = vst [vmem:[#allocation19_spill] sm:$0xff] %v3162_v22  ;;  %v3164_v9 = vsub.s32 %v1282_v53, %v1285_v25  ;;  %vm1151_vm11 = vcmp.lt.s32.totalorder %v1131_v35, 2 }
 0x21f   :  { %v1155_v11 = vsel %vm1153_vm8, %v1143_v29, 2102212464  ;;  %v1160_v39 = vsel %vm1152_vm10, %v1143_v29, %v1159_v60  ;;  %v1102_v20 = vsel %vm3140_vm4, %v2805_v40, %v1099_v19  ;;  %v4323_v7 = vand.u32 2147483647, %v2883_v56  ;;  %v344_v19 = vpop.permute.xlu0 %343 }
 0x220   :  { %v4324_v33 = vmov 0  ;;  %v1154_v5 = vsel %vm1150_vm7, %v1134_v62, %v1137_v45  ;;  %v1161_v25 = vsel %vm1151_vm11, %v1158_v49, %v1160_v39  ;;  %v1162_v53 = vsel %vm1150_vm7, %v1140_v57, %v1143_v29 }
 0x221   :  { %vm3173_vm13 = vcmp.le.f32.partialorder %v4323_v7, 0.7853982  ;;  %v1288_v4 = vsub.s32 0, %v3164_v9  ;;  %v1163_v61 = vsel %vm1153_vm8, %v1149_v15, 1326507024  ;;  %v994_v37 = vxor.u32 2147483648, %v993_v44 }
 0x222   :  { %v4325_v33 = vsel %vm3173_vm13, 4294967295, %v4324_v33  ;;  %v3183_v52 = vmul.u32.u64.low %v3128_v14, %v1161_v25  ;;  %v3184_v24 = vmul.u32.u64.high %v3128_v14, %v1161_v25, %v3183_v52  ;;  %v1156_v55 = vsel %vm1152_vm10, %v1140_v57, %v1155_v11 }
 0x223   :  { %4326 = vst [vmem:[#allocation20_spill] sm:$0xff] %v4325_v33  ;;  %v1164_v60 = vsel %vm1152_vm10, %v1146_v21, %v1163_v61  ;;  %v2196_v62 = vadd.s32 4294967169, %v1434_v23  ;;  %2318 = vsinq.f32 %v3096_v12  ;;  %v2189_v45 = vmin.u32 %v1288_v4, %v3164_v9 }
 0x224   :  { %v1165_v29 = vsel %vm1151_vm11, %v1162_v53, %v1164_v60  ;;  %v4327_v15 = vand.u32 2147483647, %v3045_v63  ;;  %v3200_v57 = vsel %vm4263_vm1, %v2541_v51, %v344_v19  ;;  %2320 = vcosq.f32 %v1102_v20 }
 0x225   :  { %v3195_v39 = vmul.u32.u64.low %v3128_v14, %v1165_v29  ;;  %v3196_v7 = vmul.u32.u64.high %v3128_v14, %v1165_v29, %v3195_v39  ;;  %v1440_v25 = vadd.s32 1, %v2196_v62  ;;  %4328 = vst [vmem:[#allocation21_spill] sm:$0xff] %v3200_v57  ;;  %v1290_v21 = vclz %v2189_v45 }
 0x226   :  { %v1437_v49 = vand.u32 8388607, %v4327_v15  ;;  %v1157_v12 = vsel %vm1151_vm11, %v1154_v5, %v1156_v55  ;;  %v1176_v23 = vadd.s32 1, %v3184_v24  ;;  %2322 = vsinq.f32 %v1102_v20 }
 0x227   :  { %v995_v11 = vsel %vm912_vm5, %v994_v37, %v993_v44  ;;  %vm1441_vm0 = vcmp.gt.s32.totalorder %v1440_v25, 0  ;;  %v2190_v4 = vadd.s32 4294967294, %v1290_v21  ;;  %v1278_v51 = vadd.s32 %v3113_v36, %v3118_v17 }
 0x228   :  { %v1438_v61 = vor.u32 8388608, %v1437_v49  ;;  %v1442_v60 = vsel %vm1441_vm0, %v1440_v25, 0  ;;  %v1173_v35 = vmul.u32 %v3128_v14, %v1157_v12  ;;  %vm1175_vm2 = vc.u32 %v3196_v7, %v3183_v52 }
 0x229   :  { %v1444_v20 = vand.u32 31, %v1442_v60  ;;  %v3216_v44 = vsel %vm3173_vm13, %v2883_v56, %v995_v11  ;;  %vm2191_vm7 = vcmp.lt.s32.totalorder %v2190_v4, 0  ;;  %v1177_v19 = vsel %vm1175_vm2, %v1176_v23, %v3184_v24 }
 0x22a   :  { %v1293_v37 = vsel %vm2191_vm7, 0, %v2190_v4  ;;  %v1178_v55 = vadd.s32 %v1177_v19, %v1173_v35  ;;  %v1329_v17 = vand.u32 2139095040, %v3200_v57  ;;  %v3221_v29 = vshrl.u32 %v1442_v60, 5 }
 0x22b   :  { %v1445_v45 = vsub.s32 32, %v1444_v20  ;;  %v1294_v36 = vsub.s32 32, %v1293_v37  ;;  %v1298_v14 = vsub.s32 4294967266, %v1293_v37  ;;  %v1447_v15 = vshll.u32 %v4301_v6, %v1444_v20 }
 0x22c   :  { %v1179_v49 = vadd.s32 536870912, %v1178_v55  ;;  %v1450_v25 = vshll.u32 %v4314_v41, %v1444_v20  ;;  %v1295_v24 = vshll.u32 %v3164_v9, %v1293_v37  ;;  %v1453_v19 = vshll.u32 %v4315_v50, %v1444_v20 }
 0x22d   :  { %v1448_v39 = vshrl.u32 %v4314_v41, %v1445_v45  ;;  %v1451_v21 = vshrl.u32 %v4315_v50, %v1445_v45  ;;  %v1296_v12 = vshrl.u32 %v1278_v51, %v1294_v36  ;;  %v1299_v23 = vadd.s32 127, %v1298_v14 }
 0x22e   :  { %v1454_v11 = vshrl.u32 %v4289_v30, %v1445_v45  ;;  %v3229_v4 = vshrl.u32 %v1179_v49, 30  ;;  %v1456_v62 = vshll.u32 %v4289_v30, %v1444_v20  ;;  %v1457_v33 = vshrl.u32 %v4295_v42, %v1445_v45 }
 0x22f   :  { %v1449_v35 = vor.u32 %v1448_v39, %v1447_v15  ;;  %v1452_v60 = vor.u32 %v1451_v21, %v1450_v25  ;;  %v1297_v5 = vor.u32 %v1296_v12, %v1295_v24  ;;  %v1300_v53 = vshll.u32 %v1299_v23, 23 }
 0x230   :  { %v3234_v31 = vpop.eup %2318  ;;  %v1181_v9 = vshll.u32 %v3229_v4, 30  ;;  %v1455_v51 = vor.u32 %v1454_v11, %v1453_v19  ;;  %v1459_v37 = vshll.u32 %v4295_v42, %v1444_v20  ;;  %v1460_v36 = vshrl.u32 %v4296_v48, %v1445_v45 }
 0x231   :  { %4329 = vst [vmem:[#allocation22_spill] sm:$0xff] %v3234_v31  ;;  %v1301_v14 = vor.u32 4788187, %v1300_v53  ;;  %v1458_v15 = vor.u32 %v1457_v33, %v1456_v62  ;;  %v1478_v49 = vshll.u32 %v1438_v61, 8  ;;  %v1330_v39 = vshrl.u32 %v1329_v17, 23  ;;  %v3239_v25 = vpop.eup %2320 }
 0x232   :  { %4330 = vst [vmem:[#allocation23_spill] sm:$0xff] %v3239_v25  ;;  %vm1224_vm8 = vcmp.lt.s32.totalorder %v2979_v28, 0  ;;  %v1304_v21 = vcvt.s32.f32 %v1297_v5  ;;  %v3242_v24 = vsub.s32 %v1178_v55, %v1181_v9  ;;  %v1446_v12 = vshrl.u32 %v4301_v6, %v1445_v45 }
 0x233   :  { %v1461_v23 = vor.u32 %v1460_v36, %v1459_v37  ;;  %v3245_v22 = vpop.eup %2322  ;;  %v1302_v11 = vand.u32 2147483647, %v1301_v14  ;;  %vm1462_vm10 = vcmp.lt.s32.totalorder %v3221_v29, 1  ;;  %vm1464_vm11 = vcmp.lt.s32.totalorder %v3221_v29, 3 }
 0x234   :  { %4331 = vst [vmem:[#allocation24_spill] sm:$0xff] %v3245_v22  ;;  %vm1465_vm0 = vcmp.lt.s32.totalorder %v3221_v29, 4  ;;  %v1184_v33 = vsub.s32 0, %v3242_v24  ;;  %v1470_v61 = vsel %vm1462_vm10, %v1449_v35, %v1452_v60  ;;  %vm1463_vm2 = vcmp.lt.s32.totalorder %v3221_v29, 2 }
 0x235   :  { %v1467_v53 = vsel %vm1465_vm0, %v1455_v51, 2102212464  ;;  %v1471_v62 = vsel %vm1465_vm0, %v1458_v15, 920167782  ;;  %v1466_v20 = vsel %vm1462_vm10, %v1446_v12, %v1449_v35  ;;  %v1474_v55 = vsel %vm1462_vm10, %v1452_v60, %v1455_v51 }
 0x236   :  { %v1472_v5 = vsel %vm1464_vm11, %v1455_v51, %v1471_v62  ;;  %v1305_v45 = vmul.f32 %v1304_v21, %v1302_v11  ;;  %v2185_v17 = vmin.u32 %v1184_v33, %v3242_v24  ;;  %v1475_v9 = vsel %vm1465_vm0, %v1461_v23, 1326507024 }
 0x237   :  { %v1473_v19 = vsel %vm1463_vm2, %v1470_v61, %v1472_v5  ;;  %v1468_v37 = vsel %vm1464_vm11, %v1452_v60, %v1467_v53  ;;  %v1476_v36 = vsel %vm1464_vm11, %v1458_v15, %v1475_v9  ;;  %v4332_v22 = vand.u32 2147483647, %v2979_v28 }
 0x238   :  { %v3255_v14 = vmul.u32.u64.low %v1478_v49, %v1473_v19  ;;  %v3256_v25 = vmul.u32.u64.high %v1478_v49, %v1473_v19, %v3255_v14  ;;  %v4333_v31 = vmov 0  ;;  %v1186_v35 = vclz %v2185_v17  ;;  %v350_v19 = vpop.permute.xlu1 %349 }
 0x239   :  { %vm3261_vm7 = vcmp.le.f32.partialorder %v4332_v22, 0.7853982  ;;  %v1477_v51 = vsel %vm1463_vm2, %v1474_v55, %v1476_v36  ;;  %v2192_v21 = vadd.s32 4294967169, %v1330_v39  ;;  %v4336_v12 = vand.u32 2147483647, %v3200_v57 }
 0x23a   :  { %v4334_v31 = vsel %vm3261_vm7, 4294967295, %v4333_v31  ;;  %v4337_v60 = vsub.s32 4, %v2982_v27  ;;  %2324 = vcosq.f32 %v3216_v44  ;;  %v1306_v33 = vxor.u32 2147483648, %v1305_v45 }
 0x23b   :  { %4335 = vst [vmem:[#allocation25_spill] sm:$0xff] %v4334_v31  ;;  %v1333_v23 = vand.u32 8388607, %v4336_v12  ;;  %v3277_v22 = vmul.u32.u64.low %v1478_v49, %v1477_v51  ;;  %v3278_v11 = vmul.u32.u64.high %v1478_v49, %v1477_v51, %v3277_v22  ;;  %v2186_v53 = vadd.s32 4294967294, %v1186_v35 }
 0x23c   :  { %v3274_v15 = vsel %vm1016_vm9, %v4337_v60, %v2982_v27  ;;  %v1469_v39 = vsel %vm1463_vm2, %v1466_v20, %v1468_v37  ;;  %v1336_v61 = vadd.s32 1, %v2192_v21  ;;  %v4338_v62 = vsub.s32 4, %v3081_v54 }
 0x23d   :  { %2326 = vsinq.f32 %v3216_v44  ;;  %v4339_v27 = vsub.s32 4, %v3151_v43  ;;  %v1488_v29 = vadd.s32 1, %v3256_v25  ;;  %v1174_v20 = vadd.s32 %v3183_v52, %v3196_v7 }
 0x23e   :  { %v3287_v5 = vsel %vm912_vm5, %v4338_v62, %v3081_v54  ;;  %vm2187_vm9 = vcmp.lt.s32.totalorder %v2186_v53, 0  ;;  %v1334_v17 = vor.u32 8388608, %v1333_v23  ;;  %vm1337_vm10 = vcmp.gt.s32.totalorder %v1336_v61, 0  ;;  %v348_v54 = vpop.permute.xlu0 %347 }
 0x23f   :  { %v3295_v55 = vsel %vm1224_vm8, %v4339_v27, %v3151_v43  ;;  %v1189_v9 = vsel %vm2187_vm9, 0, %v2186_v53  ;;  %v1485_v37 = vmul.u32 %v1478_v49, %v1469_v39  ;;  %vm1487_vm5 = vc.u32 %v3278_v11, %v3255_v14 }
 0x240   :  { %4340 = vst [vmem:[#allocation26_spill] sm:$0xff] %v3295_v55  ;;  %v1338_v44 = vsel %vm1337_vm10, %v1336_v61, 0  ;;  %v1307_v43 = vsel %vm1224_vm8, %v1306_v33, %v1305_v45  ;;  %v1190_v36 = vsub.s32 32, %v1189_v9  ;;  %v1194_v35 = vsub.s32 4294967266, %v1189_v9 }
 0x241   :  { %v1489_v51 = vsel %vm1487_vm5, %v1488_v29, %v3256_v25  ;;  %v1340_v52 = vand.u32 31, %v1338_v44  ;;  %v3307_v7 = vsel %vm4263_vm1, %v2550_v58, %v350_v19  ;;  %v3311_v49 = vsel %vm4263_vm1, %v2553_v59, %v348_v54 }
 0x242   :  { %v1490_v21 = vadd.s32 %v1489_v51, %v1485_v37  ;;  %4341 = vst [vmem:[#allocation27_spill] sm:$0xff] %v3307_v7  ;;  %v1191_v12 = vshll.u32 %v3242_v24, %v1189_v9  ;;  %v1192_v23 = vshrl.u32 %v1174_v20, %v1190_v36  ;;  %v1195_v60 = vadd.s32 127, %v1194_v35 }
 0x243   :  { %v1310_v25 = vsel %vm3261_vm7, %v2979_v28, %v1307_v43  ;;  %v1341_v33 = vsub.s32 32, %v1340_v52  ;;  %v3318_v53 = vshll.u32 %v1334_v17, 8  ;;  %v1343_v61 = vshll.u32 %v4301_v6, %v1340_v52 }
 0x244   :  { %v1491_v22 = vadd.s32 536870912, %v1490_v21  ;;  %v1193_v58 = vor.u32 %v1192_v23, %v1191_v12  ;;  %v1196_v39 = vshll.u32 %v1195_v60, 23  ;;  %v1641_v59 = vand.u32 2139095040, %v3307_v7 }
 0x245   :  { %v1344_v24 = vshrl.u32 %v4314_v41, %v1341_v33  ;;  %v1346_v27 = vshll.u32 %v4314_v41, %v1340_v52  ;;  %v1347_v29 = vshrl.u32 %v4315_v50, %v1341_v33  ;;  %v1350_v19 = vshrl.u32 %v4289_v30, %v1341_v33 }
 0x246   :  { %v3322_v62 = vshrl.u32 %v1491_v22, 30  ;;  %v1197_v20 = vor.u32 4788187, %v1196_v39  ;;  %v1352_v17 = vshll.u32 %v4289_v30, %v1340_v52  ;;  %v1353_v54 = vshrl.u32 %v4295_v42, %v1341_v33 }
 0x247   :  { %v1200_v9 = vcvt.s32.f32 %v1193_v58  ;;  %v1339_v43 = vshrl.u32 %v1338_v44, 5  ;;  %v1349_v36 = vshll.u32 %v4315_v50, %v1340_v52  ;;  %v3332_v35 = vpop.eup %2324  ;;  %v1345_v12 = vor.u32 %v1344_v24, %v1343_v61 }
 0x248   :  { %v1493_v37 = vshll.u32 %v3322_v62, 30  ;;  %v1198_v51 = vand.u32 2147483647, %v1197_v20  ;;  %v1348_v23 = vor.u32 %v1347_v29, %v1346_v27  ;;  %v1354_v60 = vor.u32 %v1353_v54, %v1352_v17 }
 0x249   :  { %vm1120_vm8 = vcmp.lt.s32.totalorder %v3041_v16, 0  ;;  %v1351_v39 = vor.u32 %v1350_v19, %v1349_v36  ;;  %v1355_v45 = vshll.u32 %v4295_v42, %v1340_v52  ;;  %v1356_v58 = vshrl.u32 %v4296_v48, %v1341_v33 }
 0x24a   :  { %v3335_v22 = vsub.s32 %v1490_v21, %v1493_v37  ;;  %v3339_v28 = vpop.eup %2326  ;;  %v1201_v44 = vmul.f32 %v1200_v9, %v1198_v51  ;;  %v1342_v56 = vshrl.u32 %v4301_v6, %v1341_v33  ;;  %v1642_v20 = vshrl.u32 %v1641_v59, 23 }
 0x24b   :  { %v1357_v24 = vor.u32 %v1356_v58, %v1355_v45  ;;  %vm1358_vm11 = vcmp.lt.s32.totalorder %v1339_v43, 1  ;;  %vm1361_vm0 = vcmp.lt.s32.totalorder %v1339_v43, 4  ;;  %v4342_v21 = vand.u32 2147483647, %v3041_v16 }
 0x24c   :  { %v1496_v61 = vsub.s32 0, %v3335_v22  ;;  %v4343_v27 = vmov 0  ;;  %vm1359_vm9 = vcmp.lt.s32.totalorder %v1339_v43, 2  ;;  %vm1360_vm10 = vcmp.lt.s32.totalorder %v1339_v43, 3 }
 0x24d   :  { %vm3346_vm2 = vcmp.le.f32.partialorder %v4342_v21, 0.7853982  ;;  %v1366_v52 = vsel %vm1358_vm11, %v1345_v12, %v1348_v23  ;;  %v1367_v29 = vsel %vm1361_vm0, %v1354_v60, 920167782  ;;  %v1363_v19 = vsel %vm1361_vm0, %v1351_v39, 2102212464 }
 0x24e   :  { %v4344_v27 = vsel %vm3346_vm2, 4294967295, %v4343_v27  ;;  %v2197_v33 = vmin.u32 %v1496_v61, %v3335_v22  ;;  %v1368_v59 = vsel %vm1360_vm10, %v1351_v39, %v1367_v29  ;;  %v1370_v45 = vsel %vm1358_vm11, %v1348_v23, %v1351_v39 }
 0x24f   :  { %4345 = vst [vmem:[#allocation28_spill] sm:$0xff] %v4344_v27  ;;  %2328 = vcosq.f32 %v1310_v25  ;;  %v1202_v17 = vxor.u32 2147483648, %v1201_v44  ;;  %v1369_v54 = vsel %vm1359_vm9, %v1366_v52, %v1368_v59  ;;  %v1371_v9 = vsel %vm1361_vm0, %v1357_v24, 1326507024 }
 0x250   :  { %vm1432_vm5 = vcmp.lt.s32.totalorder %v3045_v63, 0  ;;  %v1498_v37 = vclz %v2197_v33  ;;  %v1362_v36 = vsel %vm1358_vm11, %v1342_v56, %v1345_v12  ;;  %v1372_v51 = vsel %vm1360_vm10, %v1354_v60, %v1371_v9 }
 0x251   :  { %v2204_v58 = vadd.s32 4294967169, %v1642_v20  ;;  %v1364_v61 = vsel %vm1360_vm10, %v1348_v23, %v1363_v19  ;;  %v1373_v21 = vsel %vm1359_vm9, %v1370_v45, %v1372_v51  ;;  %v4346_v33 = vand.u32 2147483647, %v3307_v7 }
 0x252   :  { %v3361_v29 = vmul.u32.u64.low %v3318_v53, %v1369_v54  ;;  %v3362_v39 = vmul.u32.u64.high %v3318_v53, %v1369_v54, %v3361_v29  ;;  %v2198_v31 = vadd.s32 4294967294, %v1498_v37  ;;  %2330 = vsinq.f32 %v1310_v25 }
 0x253   :  { %v3366_v24 = vmul.u32.u64.low %v3318_v53, %v1373_v21  ;;  %v3367_v52 = vmul.u32.u64.high %v3318_v53, %v1373_v21, %v3366_v24  ;;  %v1645_v56 = vand.u32 8388607, %v4346_v33  ;;  %v1203_v12 = vsel %vm1120_vm8, %v1202_v17, %v1201_v44 }
 0x254   :  { %v4347_v23 = vsub.s32 4, %v3229_v4  ;;  %v1648_v20 = vadd.s32 1, %v2204_v58  ;;  %v1486_v19 = vadd.s32 %v3255_v14, %v3278_v11  ;;  %vm2199_vm11 = vcmp.lt.s32.totalorder %v2198_v31, 0 }
 0x255   :  { %v1365_v59 = vsel %vm1359_vm9, %v1362_v36, %v1364_v61  ;;  %v4258_v45 = vand.u32 2147483647, %v3311_v49  ;;  %v1501_v25 = vsel %vm2199_vm11, 0, %v2198_v31  ;;  %v1516_v54 = vsub.s32 4, %v3322_v62 }
 0x256   :  { %v3378_v60 = vsel %vm1120_vm8, %v4347_v23, %v3229_v4  ;;  %v1384_v44 = vadd.s32 1, %v3362_v39  ;;  %vm1649_vm0 = vcmp.gt.s32.totalorder %v1648_v20, 0  ;;  %v3389_v4 = vsel %vm3346_vm2, %v3041_v16, %v1203_v12 }
 0x257   :  { %4348 = vst [vmem:[#allocation29_spill] sm:$0xff] %v3378_v60  ;;  %v1502_v17 = vsub.s32 32, %v1501_v25  ;;  %v1506_v9 = vsub.s32 4294967266, %v1501_v25  ;;  %v1646_v37 = vor.u32 8388608, %v1645_v56  ;;  %v1381_v14 = vmul.u32 %v3318_v53, %v1365_v59 }
 0x258   :  { %vm1383_vm8 = vc.u32 %v3367_v52, %v3361_v29  ;;  %v1650_v11 = vsel %vm1649_vm0, %v1648_v20, 0  ;;  %v1537_v31 = vand.u32 2139095040, %v3311_v49  ;;  %v1503_v43 = vshll.u32 %v3335_v22, %v1501_v25 }
 0x259   :  { %v1504_v36 = vshrl.u32 %v1486_v19, %v1502_v17  ;;  %v1507_v51 = vadd.s32 127, %v1506_v9  ;;  %v1385_v58 = vsel %vm1383_vm8, %v1384_v44, %v3362_v39  ;;  %2332 = vcosq.f32 %v3389_v4 }
 0x25a   :  { %v3401_v61 = vsel %vm1432_vm5, %v1516_v54, %v3322_v62  ;;  %v1386_v53 = vadd.s32 %v1385_v58, %v1381_v14  ;;  %v1652_v21 = vand.u32 31, %v1650_v11  ;;  %v3403_v56 = vshll.u32 %v1646_v37, 8 }
 0x25b   :  { %4349 = vst [vmem:[#allocation30_spill] sm:$0xff] %v3401_v61  ;;  %v1505_v24 = vor.u32 %v1504_v36, %v1503_v43  ;;  %v1508_v33 = vshll.u32 %v1507_v51, 23  ;;  %v3407_v22 = vand.u32 8388607, %v4258_v45  ;;  %v3409_v23 = vshrl.u32 %v1650_v11, 5 }
 0x25c   :  { %v1387_v12 = vadd.s32 536870912, %v1386_v53  ;;  %v1653_v39 = vsub.s32 32, %v1652_v21  ;;  %v1538_v20 = vshrl.u32 %v1537_v31, 23  ;;  %v3411_v19 = vpop.eup %2328  ;;  %v1655_v25 = vshll.u32 %v4301_v6, %v1652_v21 }
 0x25d   :  { %4350 = vst [vmem:[#allocation31_spill] sm:$0xff] %v3411_v19  ;;  %v1509_v59 = vor.u32 4788187, %v1508_v33  ;;  %v1512_v62 = vcvt.s32.f32 %v1505_v24  ;;  %v1658_v54 = vshll.u32 %v4314_v41, %v1652_v21  ;;  %v1661_v37 = vshll.u32 %v4315_v50, %v1652_v21 }
 0x25e   :  { %v3415_v44 = vshrl.u32 %v1387_v12, 30  ;;  %v1656_v17 = vshrl.u32 %v4314_v41, %v1653_v39  ;;  %v1659_v9 = vshrl.u32 %v4315_v50, %v1653_v39  ;;  %v1662_v11 = vshrl.u32 %v4289_v30, %v1653_v39 }
 0x25f   :  { %v1510_v14 = vand.u32 2147483647, %v1509_v59  ;;  %v1664_v31 = vshll.u32 %v4289_v30, %v1652_v21  ;;  %v1665_v43 = vshrl.u32 %v4295_v42, %v1653_v39  ;;  %v1667_v24 = vshll.u32 %v4295_v42, %v1652_v21  ;;  %v3425_v33 = vpop.eup %2330 }
 0x260   :  { %v1389_v36 = vshll.u32 %v3415_v44, 30  ;;  %v1657_v51 = vor.u32 %v1656_v17, %v1655_v25  ;;  %v1660_v58 = vor.u32 %v1659_v9, %v1658_v54  ;;  %4351 = vst [vmem:[#allocation32_spill] sm:$0xff] %v3425_v33  ;;  %v4352_v12 = vand.u32 2147483647, %v3045_v63 }
 0x261   :  { %v4353_v45 = vmov 0  ;;  %v1513_v59 = vmul.f32 %v1512_v62, %v1510_v14  ;;  %v1663_v16 = vor.u32 %v1662_v11, %v1661_v37  ;;  %v1666_v61 = vor.u32 %v1665_v43, %v1664_v31  ;;  %v354_v31 = vpop.permute.xlu1 %353 }
 0x262   :  { %vm3429_vm9 = vcmp.le.f32.partialorder %v4352_v12, 0.7853982  ;;  %v1668_v27 = vshrl.u32 %v4296_v48, %v1653_v39  ;;  %v3434_v60 = vsub.s32 %v1386_v53, %v1389_v36  ;;  %vm1670_vm10 = vcmp.lt.s32.totalorder %v3409_v23, 1 }
 0x263   :  { %v4354_v45 = vsel %vm3429_vm9, 4294967295, %v4353_v45  ;;  %vm1673_vm11 = vcmp.lt.s32.totalorder %v3409_v23, 4  ;;  %v2200_v21 = vadd.s32 4294967169, %v1538_v20  ;;  %v1514_v25 = vxor.u32 2147483648, %v1513_v59 }
 0x264   :  { %4355 = vst [vmem:[#allocation33_spill] sm:$0xff] %v4354_v45  ;;  %v1654_v54 = vshrl.u32 %v4301_v6, %v1653_v39  ;;  %v1669_v17 = vor.u32 %v1668_v27, %v1667_v24  ;;  %v1675_v9 = vsel %vm1673_vm11, %v1663_v16, 2102212464  ;;  %v1392_v62 = vsub.s32 0, %v3434_v60 }
 0x265   :  { %vm1672_vm0 = vcmp.lt.s32.totalorder %v3409_v23, 3  ;;  %v1678_v37 = vsel %vm1670_vm10, %v1657_v51, %v1660_v58  ;;  %v1679_v53 = vsel %vm1673_vm11, %v1666_v61, 920167782  ;;  %vm1671_vm8 = vcmp.lt.s32.totalorder %v3409_v23, 2 }
 0x266   :  { %v1674_v14 = vsel %vm1670_vm10, %v1654_v54, %v1657_v51  ;;  %v1680_v11 = vsel %vm1672_vm0, %v1663_v16, %v1679_v53  ;;  %v1682_v20 = vsel %vm1670_vm10, %v1660_v58, %v1663_v16  ;;  %v2193_v39 = vmin.u32 %v1392_v62, %v3434_v60  ;;  %v3451_v24 = vpop.eup %2332 }
 0x267   :  { %v1676_v27 = vsel %vm1672_vm0, %v1660_v58, %v1675_v9  ;;  %v1681_v43 = vsel %vm1671_vm8, %v1678_v37, %v1680_v11  ;;  %v1683_v36 = vsel %vm1673_vm11, %v1669_v17, 1326507024  ;;  %4356 = vst [vmem:[#allocation34_spill] sm:$0xff] %v3451_v24  ;;  %v1515_v12 = vsel %vm1432_vm5, %v1514_v25, %v1513_v59 }
 0x268   :  { %v1684_v19 = vsel %vm1672_vm0, %v1666_v61, %v1683_v36  ;;  %v3456_v51 = vmul.u32.u64.low %v3403_v56, %v1681_v43  ;;  %v3457_v54 = vmul.u32.u64.high %v3403_v56, %v1681_v43, %v3456_v51  ;;  %v1394_v16 = vclz %v2193_v39 }
 0x269   :  { %v1685_v58 = vsel %vm1671_vm8, %v1682_v20, %v1684_v19  ;;  %v1542_v9 = vor.u32 8388608, %v3407_v22  ;;  %v3465_v17 = vsel %vm4263_vm1, %v2564_v2, %v354_v31  ;;  %2334 = vsinq.f32 %v3389_v4 }
 0x26a   :  { %v3469_v59 = vmul.u32.u64.low %v3403_v56, %v1685_v58  ;;  %v3470_v61 = vmul.u32.u64.high %v3403_v56, %v1685_v58, %v3469_v59  ;;  %v1544_v25 = vadd.s32 1, %v2200_v21  ;;  %v3475_v62 = vsel %vm3429_vm9, %v3045_v63, %v1515_v12 }
 0x26b   :  { %v1382_v19 = vadd.s32 %v3361_v29, %v3367_v52  ;;  %v2194_v22 = vadd.s32 4294967294, %v1394_v16  ;;  %v1677_v2 = vsel %vm1671_vm8, %v1674_v14, %v1676_v27  ;;  %v1696_v37 = vadd.s32 1, %v3457_v54 }
 0x26c   :  { %vm1545_vm5 = vcmp.gt.s32.totalorder %v1544_v25, 0  ;;  %v4264_v4 = vand.u32 2147483647, %v3465_v17  ;;  %v1849_v53 = vand.u32 2139095040, %v3465_v17  ;;  %v3485_v20 = vshll.u32 %v1542_v9, 8 }
 0x26d   :  { %vm2195_vm10 = vcmp.lt.s32.totalorder %v2194_v22, 0  ;;  %v1546_v11 = vsel %vm1545_vm5, %v1544_v25, 0  ;;  %v1693_v29 = vmul.u32 %v3403_v56, %v1677_v2  ;;  %vm1695_vm11 = vc.u32 %v3470_v61, %v3456_v51 }
 0x26e   :  { %v1397_v31 = vsel %vm2195_vm10, 0, %v2194_v22  ;;  %v3490_v52 = vshrl.u32 %v1546_v11, 5  ;;  %2336 = vcosq.f32 %v3475_v62  ;;  %v1697_v39 = vsel %vm1695_vm11, %v1696_v37, %v3457_v54 }
 0x26f   :  { %v1398_v23 = vsub.s32 32, %v1397_v31  ;;  %v1402_v14 = vsub.s32 4294967266, %v1397_v31  ;;  %v1698_v27 = vadd.s32 %v1697_v39, %v1693_v29  ;;  %v1548_v43 = vand.u32 31, %v1546_v11 }
 0x270   :  { %v1850_v36 = vshrl.u32 %v1849_v53, 23  ;;  %v3496_v12 = vand.u32 8388607, %v4264_v4  ;;  %v1399_v56 = vshll.u32 %v3434_v60, %v1397_v31  ;;  %vm1566_vm0 = vcmp.lt.s32.totalorder %v3490_v52, 1 }
 0x271   :  { %v1400_v16 = vshrl.u32 %v1382_v19, %v1398_v23  ;;  %v1403_v58 = vadd.s32 127, %v1402_v14  ;;  %v1699_v9 = vadd.s32 536870912, %v1698_v27  ;;  %v1549_v59 = vsub.s32 32, %v1548_v43 }
 0x272   :  { %vm1567_vm8 = vcmp.lt.s32.totalorder %v3490_v52, 2  ;;  %vm1568_vm5 = vcmp.lt.s32.totalorder %v3490_v52, 3  ;;  %v1551_v22 = vshll.u32 %v4301_v6, %v1548_v43  ;;  %v1554_v2 = vshll.u32 %v4314_v41, %v1548_v43 }
 0x273   :  { %v1401_v54 = vor.u32 %v1400_v16, %v1399_v56  ;;  %v1404_v25 = vshll.u32 %v1403_v58, 23  ;;  %vm1328_vm10 = vcmp.lt.s32.totalorder %v3200_v57, 0  ;;  %v3505_v37 = vshrl.u32 %v1699_v9, 30 }
 0x274   :  { %v1552_v60 = vshrl.u32 %v4314_v41, %v1549_v59  ;;  %v1555_v19 = vshrl.u32 %v4315_v50, %v1549_v59  ;;  %v1557_v53 = vshll.u32 %v4315_v50, %v1548_v43  ;;  %v4357_v11 = vand.u32 2147483647, %v3200_v57 }
 0x275   :  { %v4358_v31 = vmov 0  ;;  %v1405_v29 = vor.u32 4788187, %v1404_v25  ;;  %v1558_v23 = vshrl.u32 %v4289_v30, %v1549_v59  ;;  %v1560_v14 = vshll.u32 %v4289_v30, %v1548_v43 }
 0x276   :  { %vm3512_vm11 = vcmp.le.f32.partialorder %v4357_v11, 0.7853982  ;;  %v1561_v39 = vshrl.u32 %v4295_v42, %v1549_v59  ;;  %v1701_v56 = vshll.u32 %v3505_v37, 30  ;;  %v1553_v16 = vor.u32 %v1552_v60, %v1551_v22  ;;  %v3521_v9 = vpop.eup %2334 }
 0x277   :  { %v4359_v31 = vsel %vm3512_vm11, 4294967295, %v4358_v31  ;;  %v1556_v58 = vor.u32 %v1555_v19, %v1554_v2  ;;  %vm1569_vm1 = vcmp.lt.s32.totalorder %v3490_v52, 4  ;;  %v1406_v4 = vand.u32 2147483647, %v1405_v29 }
 0x278   :  { %4360 = vst [vmem:[#allocation35_spill] sm:$0xff] %v4359_v31  ;;  %v1408_v11 = vcvt.s32.f32 %v1401_v54  ;;  %v1559_v21 = vor.u32 %v1558_v23, %v1557_v53  ;;  %v1562_v63 = vor.u32 %v1561_v39, %v1560_v14  ;;  %v3523_v45 = vsub.s32 %v1698_v27, %v1701_v56 }
 0x279   :  { %v1550_v25 = vshrl.u32 %v4301_v6, %v1549_v59  ;;  %v1563_v24 = vshll.u32 %v4295_v42, %v1548_v43  ;;  %v1564_v33 = vshrl.u32 %v4296_v48, %v1549_v59  ;;  %v1574_v2 = vsel %vm1566_vm0, %v1553_v16, %v1556_v58  ;;  %v352_v59 = vpop.permute.xlu0 %351 }
 0x27a   :  { %v1409_v55 = vmul.f32 %v1408_v11, %v1406_v4  ;;  %v1571_v22 = vsel %vm1569_vm1, %v1559_v21, 2102212464  ;;  %v1575_v54 = vsel %vm1569_vm1, %v1562_v63, 920167782  ;;  %v1704_v60 = vsub.s32 0, %v3523_v45 }
 0x27b   :  { %v1565_v27 = vor.u32 %v1564_v33, %v1563_v24  ;;  %v1570_v19 = vsel %vm1566_vm0, %v1550_v25, %v1553_v16  ;;  %v1576_v43 = vsel %vm1568_vm5, %v1559_v21, %v1575_v54  ;;  %v1572_v53 = vsel %vm1568_vm5, %v1556_v58, %v1571_v22  ;;  %v3545_v14 = vpop.eup %2336 }
 0x27c   :  { %v1410_v4 = vxor.u32 2147483648, %v1409_v55  ;;  %v1577_v29 = vsel %vm1567_vm8, %v1574_v2, %v1576_v43  ;;  %v1578_v23 = vsel %vm1566_vm0, %v1556_v58, %v1559_v21  ;;  %4361 = vst [vmem:[#allocation36_spill] sm:$0xff] %v3545_v14  ;;  %v2205_v33 = vmin.u32 %v1704_v60, %v3523_v45 }
 0x27d   :  { %v1579_v24 = vsel %vm1569_vm1, %v1565_v27, 1326507024  ;;  %v3551_v39 = vmul.u32.u64.low %v3485_v20, %v1577_v29  ;;  %v3552_v56 = vmul.u32.u64.high %v3485_v20, %v1577_v29, %v3551_v39  ;;  %v2212_v25 = vadd.s32 4294967169, %v1850_v36 }
 0x27e   :  { %v1411_v16 = vsel %vm1328_vm10, %v1410_v4, %v1409_v55  ;;  %v1580_v11 = vsel %vm1568_vm5, %v1562_v63, %v1579_v24  ;;  %vm4362_vm0 = vcmask 97280   ;;  %v1706_v22 = vclz %v2205_v33 }
 0x27f   :  { %v3561_v21 = vsel %vm4362_vm0, %v2567_v3, %v352_v59  ;;  %v3566_v58 = vsel %vm3512_vm11, %v3200_v57, %v1411_v16  ;;  %v1573_v2 = vsel %vm1567_vm8, %v1570_v19, %v1572_v53  ;;  %v1581_v55 = vsel %vm1567_vm8, %v1578_v23, %v1580_v11  ;;  %v356_v53 = vpop.permute.xlu0 %355 }
 0x280   :  { %v3573_v54 = vmul.u32.u64.low %v3485_v20, %v1581_v55  ;;  %v3574_v63 = vmul.u32.u64.high %v3485_v20, %v1581_v55, %v3573_v54  ;;  %v1854_v36 = vor.u32 8388608, %v3496_v12  ;;  %v1856_v3 = vadd.s32 1, %v2212_v25 }
 0x281   :  { %2338 = vsinq.f32 %v3475_v62  ;;  %v4363_v60 = vsub.s32 4, %v3415_v44  ;;  %v2206_v19 = vadd.s32 4294967294, %v1706_v22  ;;  %v1592_v52 = vadd.s32 1, %v3552_v56 }
 0x282   :  { %v1694_v43 = vadd.s32 %v3456_v51, %v3470_v61  ;;  %vm1857_vm1 = vcmp.gt.s32.totalorder %v1856_v3, 0  ;;  %v4269_v12 = vand.u32 2147483647, %v3561_v21  ;;  %2340 = vcosq.f32 %v3566_v58 }
 0x283   :  { %v3583_v27 = vsel %vm1328_vm10, %v4363_v60, %v3415_v44  ;;  %vm2207_vm8 = vcmp.lt.s32.totalorder %v2206_v19, 0  ;;  %v1589_v62 = vmul.u32 %v3485_v20, %v1573_v2  ;;  %v1858_v4 = vsel %vm1857_vm1, %v1856_v3, 0  ;;  %vm4365_vm10 = vmmov %vm4362_vm0 }
 0x284   :  { %4364 = vst [vmem:[#allocation37_spill] sm:$0xff] %v3583_v27  ;;  %v1709_v44 = vsel %vm2207_vm8, 0, %v2206_v19  ;;  %vm1591_vm5 = vc.u32 %v3574_v63, %v3551_v39  ;;  %v3594_v29 = vshrl.u32 %v1858_v4, 5  ;;  %v3596_v23 = vshll.u32 %v1854_v36, 8 }
 0x285   :  { %v1710_v51 = vsub.s32 32, %v1709_v44  ;;  %v1714_v61 = vsub.s32 4294967266, %v1709_v44  ;;  %v1593_v33 = vsel %vm1591_vm5, %v1592_v52, %v3552_v56  ;;  %v1745_v24 = vand.u32 2139095040, %v3561_v21 }
 0x286   :  { %v1594_v16 = vadd.s32 %v1593_v33, %v1589_v62  ;;  %v1860_v11 = vand.u32 31, %v1858_v4  ;;  %v3602_v20 = vand.u32 8388607, %v4269_v12  ;;  %v3606_v25 = vsel %vm4365_vm10, %v2576_v8, %v356_v53 }
 0x287   :  { %v1711_v22 = vshll.u32 %v3523_v45, %v1709_v44  ;;  %v1712_v2 = vshrl.u32 %v1694_v43, %v1710_v51  ;;  %v1715_v55 = vadd.s32 127, %v1714_v61  ;;  %vm1878_vm0 = vcmp.lt.s32.totalorder %v3594_v29, 1 }
 0x288   :  { %v1595_v54 = vadd.s32 536870912, %v1594_v16  ;;  %v1861_v56 = vsub.s32 32, %v1860_v11  ;;  %vm1880_vm8 = vcmp.lt.s32.totalorder %v3594_v29, 3  ;;  %v1863_v60 = vshll.u32 %v4301_v6, %v1860_v11 }
 0x289   :  { %v1713_v36 = vor.u32 %v1712_v2, %v1711_v22  ;;  %v1716_v3 = vshll.u32 %v1715_v55, 23  ;;  %v1866_v19 = vshll.u32 %v4314_v41, %v1860_v11  ;;  %v1869_v43 = vshll.u32 %v4315_v50, %v1860_v11 }
 0x28a   :  { %v3615_v8 = vshrl.u32 %v1595_v54, 30  ;;  %v1864_v45 = vshrl.u32 %v4314_v41, %v1861_v56  ;;  %v1867_v52 = vshrl.u32 %v4315_v50, %v1861_v56  ;;  %v4366_v62 = vand.u32 2147483647, %v3307_v7 }
 0x28b   :  { %v4367_v4 = vmov 0  ;;  %v1717_v53 = vor.u32 4788187, %v1716_v3  ;;  %v1870_v44 = vshrl.u32 %v4289_v30, %v1861_v56  ;;  %v1872_v51 = vshll.u32 %v4289_v30, %v1860_v11 }
 0x28c   :  { %vm3622_vm10 = vcmp.le.f32.partialorder %v4366_v62, 0.7853982  ;;  %v1873_v61 = vshrl.u32 %v4295_v42, %v1861_v56  ;;  %v1597_v33 = vshll.u32 %v3615_v8, 30  ;;  %v1865_v22 = vor.u32 %v1864_v45, %v1863_v60 }
 0x28d   :  { %v4368_v4 = vsel %vm3622_vm10, 4294967295, %v4367_v4  ;;  %v1868_v2 = vor.u32 %v1867_v52, %v1866_v19  ;;  %vm1881_vm5 = vcmp.lt.s32.totalorder %v3594_v29, 4  ;;  %v1718_v55 = vand.u32 2147483647, %v1717_v53 }
 0x28e   :  { %v1720_v54 = vcvt.s32.f32 %v1713_v36  ;;  %v1871_v12 = vor.u32 %v1870_v44, %v1869_v43  ;;  %v1874_v62 = vor.u32 %v1873_v61, %v1872_v51  ;;  %v3631_v59 = vpop.eup %2338  ;;  %v3633_v57 = vsub.s32 %v1594_v16, %v1597_v33 }
 0x28f   :  { %v1862_v3 = vshrl.u32 %v4301_v6, %v1861_v56  ;;  %v1875_v31 = vshll.u32 %v4295_v42, %v1860_v11  ;;  %v1876_v27 = vshrl.u32 %v4296_v48, %v1861_v56  ;;  %v1886_v36 = vsel %vm1878_vm0, %v1865_v22, %v1868_v2  ;;  %v3645_v16 = vpop.eup %2340 }
 0x290   :  { %v1721_v14 = vmul.f32 %v1720_v54, %v1718_v55  ;;  %v1883_v60 = vsel %vm1881_vm5, %v1871_v12, 2102212464  ;;  %v1887_v19 = vsel %vm1881_vm5, %v1874_v62, 920167782  ;;  %v1600_v45 = vsub.s32 0, %v3633_v57 }
 0x291   :  { %v1877_v52 = vor.u32 %v1876_v27, %v1875_v31  ;;  %v1882_v11 = vsel %vm1878_vm0, %v1862_v3, %v1865_v22  ;;  %v1888_v56 = vsel %vm1880_vm8, %v1871_v12, %v1887_v19  ;;  %v1884_v53 = vsel %vm1880_vm8, %v1868_v2, %v1883_v60 }
 0x292   :  { %v1722_v43 = vxor.u32 2147483648, %v1721_v14  ;;  %vm4369_vm1 = vcmp.lt.s32.totalorder %v3594_v29, 2  ;;  %v1890_v51 = vsel %vm1878_vm0, %v1868_v2, %v1871_v12  ;;  %v2201_v61 = vmin.u32 %v1600_v45, %v3633_v57 }
 0x293   :  { %v1889_v44 = vsel %vm4369_vm1, %v1886_v36, %v1888_v56  ;;  %v1891_v31 = vsel %vm1881_vm5, %v1877_v52, 1326507024  ;;  %vm4370_vm11 = vcmp.lt.s32.totalorder %v3307_v7, 0  ;;  %v1620_v55 = vsub.s32 4, %v3615_v8  ;;  %vm4371_vm0 = vmmov %vm4369_vm1 }
 0x294   :  { %v3662_v27 = vmul.u32.u64.low %v3596_v23, %v1889_v44  ;;  %v3663_v33 = vmul.u32.u64.high %v3596_v23, %v1889_v44, %v3662_v27  ;;  %v1723_v22 = vsel %vm4370_vm11, %v1722_v43, %v1721_v14  ;;  %v1892_v54 = vsel %vm1880_vm8, %v1874_v62, %v1891_v31  ;;  %vm4372_vm1 = vmmov %vm4371_vm0 }
 0x295   :  { %v1746_v3 = vshrl.u32 %v1745_v24, 23  ;;  %v1726_v12 = vsel %vm3622_vm10, %v3307_v7, %v1723_v22  ;;  %v1602_v2 = vclz %v2201_v61  ;;  %v1885_v60 = vsel %vm4371_vm0, %v1882_v11, %v1884_v53 }
 0x296   :  { %v1893_v36 = vsel %vm4372_vm1, %v1890_v51, %v1892_v54  ;;  %v1750_v52 = vor.u32 8388608, %v3602_v20  ;;  %2342 = vsinq.f32 %v3566_v58  ;;  %v4373_v24 = vsub.s32 4, %v3505_v37 }
 0x297   :  { %v3679_v19 = vmul.u32.u64.low %v3596_v23, %v1893_v36  ;;  %v3680_v14 = vmul.u32.u64.high %v3596_v23, %v1893_v36, %v3679_v19  ;;  %v2208_v45 = vadd.s32 4294967169, %v1746_v3  ;;  %v2202_v11 = vadd.s32 4294967294, %v1602_v2 }
 0x298   :  { %v3689_v62 = vsel %vm4370_vm11, %v4373_v24, %v3505_v37  ;;  %v1904_v29 = vadd.s32 1, %v3663_v33  ;;  %2344 = vcosq.f32 %v1726_v12  ;;  %v1590_v56 = vadd.s32 %v3551_v39, %v3574_v63 }
 0x299   :  { %v1752_v43 = vadd.s32 1, %v2208_v45  ;;  %v1953_v53 = vand.u32 2139095040, %v3606_v25  ;;  %2346 = vsinq.f32 %v1726_v12  ;;  %vm2203_vm8 = vcmp.lt.s32.totalorder %v2202_v11, 0 }
 0x29a   :  { %vm4374_vm5 = vcmp.lt.s32.totalorder %v3311_v49, 0  ;;  %v1901_v37 = vmul.u32 %v3596_v23, %v1885_v60  ;;  %v1605_v20 = vsel %vm2203_vm8, 0, %v2202_v11  ;;  %vm1903_vm0 = vc.u32 %v3680_v14, %v3662_v27 }
 0x29b   :  { %v3698_v58 = vsel %vm4374_vm5, %v1620_v55, %v3615_v8  ;;  %vm1753_vm1 = vcmp.gt.s32.totalorder %v1752_v43, 0  ;;  %v3703_v44 = vshll.u32 %v1750_v52, 8  ;;  %v1606_v39 = vsub.s32 32, %v1605_v20 }
 0x29c   :  { %4375 = vst [vmem:[#allocation38_spill] sm:$0xff] %v3698_v58  ;;  %v1610_v63 = vsub.s32 4294967266, %v1605_v20  ;;  %v1905_v51 = vsel %vm1903_vm0, %v1904_v29, %v3663_v33  ;;  %v4275_v61 = vand.u32 2147483647, %v3606_v25  ;;  %v1754_v22 = vsel %vm1753_vm1, %v1752_v43, 0 }
 0x29d   :  { %v1906_v31 = vadd.s32 %v1905_v51, %v1901_v37  ;;  %v1954_v54 = vshrl.u32 %v1953_v53, 23  ;;  %v479_v23 = vsel %vm2792_vm14, 0, %v2814_v1  ;;  %v1607_v8 = vshll.u32 %v3633_v57, %v1605_v20 }
 0x29e   :  { %v1608_v55 = vshrl.u32 %v1590_v56, %v1606_v39  ;;  %v1611_v3 = vadd.s32 127, %v1610_v63  ;;  %v1756_v12 = vand.u32 31, %v1754_v22  ;;  %v3711_v60 = vshrl.u32 %v1754_v22, 5 }
 0x29f   :  { %v1907_v2 = vadd.s32 536870912, %v1906_v31  ;;  %v3713_v36 = vadd.s32 4294967169, %v1954_v54  ;;  %v3718_v24 = vand.u32 8388607, %v4275_v61  ;;  %v3724_v11 = vadd.s32 3, %v479_v23 }
 0x2a0   :  { %v1609_v19 = vor.u32 %v1608_v55, %v1607_v8  ;;  %v1612_v45 = vshll.u32 %v1611_v3, 23  ;;  %v1757_v52 = vsub.s32 32, %v1756_v12  ;;  %v1759_v1 = vshll.u32 %v4301_v6, %v1756_v12 }
 0x2a1   :  { %v3720_v0 = vshrl.u32 %v1907_v2, 30  ;;  %v1762_v57 = vshll.u32 %v4314_v41, %v1756_v12  ;;  %v4376_v29 = vand.u32 2147483647, %v3311_v49  ;;  %v4377_v56 = vmov 0 }
 0x2a2   :  { %v1613_v43 = vor.u32 4788187, %v1612_v45  ;;  %v1760_v53 = vshrl.u32 %v4314_v41, %v1757_v52  ;;  %v1765_v37 = vshll.u32 %v4315_v50, %v1756_v12  ;;  %v1768_v20 = vshll.u32 %v4289_v30, %v1756_v12 }
 0x2a3   :  { %vm3728_vm14 = vcmp.le.f32.partialorder %v4376_v29, 0.7853982  ;;  %v1616_v39 = vcvt.s32.f32 %v1609_v19  ;;  %v1909_v63 = vshll.u32 %v3720_v0, 30  ;;  %v1763_v51 = vshrl.u32 %v4315_v50, %v1757_v52  ;;  %v3740_v3 = vpop.eup %2342 }
 0x2a4   :  { %v4378_v56 = vsel %vm3728_vm14, 4294967295, %v4377_v56  ;;  %v1766_v22 = vshrl.u32 %v4289_v30, %v1757_v52  ;;  %v1614_v54 = vand.u32 2147483647, %v1613_v43  ;;  %v1758_v23 = vshrl.u32 %v4301_v6, %v1757_v52 }
 0x2a5   :  { %v1761_v8 = vor.u32 %v1760_v53, %v1759_v1  ;;  %v1769_v55 = vshrl.u32 %v4295_v42, %v1757_v52  ;;  %v3742_v2 = vsub.s32 %v1906_v31, %v1909_v63  ;;  %v1932_v45 = vsub.s32 4, %v3720_v0  ;;  %v3745_v61 = vpop.eup %2344 }
 0x2a6   :  { %v1764_v29 = vor.u32 %v1763_v51, %v1762_v57  ;;  %v1767_v19 = vor.u32 %v1766_v22, %v1765_v37  ;;  %v1617_v33 = vmul.f32 %v1616_v39, %v1614_v54  ;;  %v1771_v43 = vshll.u32 %v4295_v42, %v1756_v12  ;;  %v3750_v53 = vpop.eup %2346 }
 0x2a7   :  { %v1770_v7 = vor.u32 %v1769_v55, %v1768_v20  ;;  %v1772_v1 = vshrl.u32 %v4296_v48, %v1757_v52  ;;  %v1912_v58 = vsub.s32 0, %v3742_v2  ;;  %vm1774_vm8 = vcmp.lt.s32.totalorder %v3711_v60, 1 }
 0x2a8   :  { %vm1776_vm5 = vcmp.lt.s32.totalorder %v3711_v60, 3  ;;  %vm1777_vm0 = vcmp.lt.s32.totalorder %v3711_v60, 4  ;;  %v1618_v31 = vxor.u32 2147483648, %v1617_v33  ;;  %v1778_v37 = vsel %vm1774_vm8, %v1758_v23, %v1761_v8 }
 0x2a9   :  { %v1773_v57 = vor.u32 %v1772_v1, %v1771_v43  ;;  %v1779_v20 = vsel %vm1777_vm0, %v1767_v19, 2102212464  ;;  %v2213_v12 = vmin.u32 %v1912_v58, %v3742_v2  ;;  %v1782_v39 = vsel %vm1774_vm8, %v1761_v8, %v1764_v29 }
 0x2aa   :  { %v1780_v52 = vsel %vm1776_vm5, %v1764_v29, %v1779_v20  ;;  %v1783_v63 = vsel %vm1777_vm0, %v1770_v7, 920167782  ;;  %vm4379_vm1 = vcmp.lt.s32.totalorder %v3311_v49, 0  ;;  %vm1775_vm11 = vcmp.lt.s32.totalorder %v3711_v60, 2 }
 0x2ab   :  { %v1619_v51 = vsel %vm4379_vm1, %v1618_v31, %v1617_v33  ;;  %v1784_v22 = vsel %vm1776_vm5, %v1767_v19, %v1783_v63  ;;  %v1786_v54 = vsel %vm1774_vm8, %v1764_v29, %v1767_v19  ;;  %v1914_v23 = vclz %v2213_v12 }
 0x2ac   :  { %v1622_v58 = vsel %vm3728_vm14, %v3311_v49, %v1619_v51  ;;  %v1785_v55 = vsel %vm1775_vm11, %v1782_v39, %v1784_v22  ;;  %v1787_v8 = vsel %vm1777_vm0, %v1773_v57, 1326507024  ;;  %v1781_v43 = vsel %vm1775_vm11, %v1778_v37, %v1780_v52 }
 0x2ad   :  { %v1788_v1 = vsel %vm1776_vm5, %v1770_v7, %v1787_v8  ;;  %v3776_v33 = vmul.u32.u64.low %v3703_v44, %v1785_v55  ;;  %v3777_v31 = vmul.u32.u64.high %v3703_v44, %v1785_v55, %v3776_v33  ;;  %2348 = vcosq.f32 %v1622_v58 }
 0x2ae   :  { %v1902_v29 = vadd.s32 %v3662_v27, %v3680_v14  ;;  %v2214_v19 = vadd.s32 4294967294, %v1914_v23  ;;  %v1789_v20 = vsel %vm1775_vm11, %v1786_v54, %v1788_v1  ;;  %v1958_v57 = vor.u32 8388608, %v3718_v24 }
 0x2af   :  { %v3782_v12 = vmul.u32.u64.low %v3703_v44, %v1789_v20  ;;  %v3783_v39 = vmul.u32.u64.high %v3703_v44, %v1789_v20, %v3782_v12  ;;  %v1960_v37 = vadd.s32 1, %v3713_v36  ;;  %2350 = vsinq.f32 %v1622_v58 }
 0x2b0   :  { %vm2215_vm8 = vcmp.lt.s32.totalorder %v2214_v19, 0  ;;  %vm4380_vm5 = vcmp.lt.s32.totalorder %v3465_v17, 0  ;;  %v1797_v60 = vmul.u32 %v3703_v44, %v1781_v43  ;;  %v1800_v14 = vadd.s32 1, %v3777_v31 }
 0x2b1   :  { %v3790_v7 = vsel %vm4380_vm5, %v1932_v45, %v3720_v0  ;;  %v1917_v27 = vsel %vm2215_vm8, 0, %v2214_v19  ;;  %vm1961_vm11 = vcmp.gt.s32.totalorder %v1960_v37, 0  ;;  %v3795_v52 = vand.u32 3, %v3724_v11 }
 0x2b2   :  { %v1918_v63 = vsub.s32 32, %v1917_v27  ;;  %v1922_v24 = vsub.s32 4294967266, %v1917_v27  ;;  %v1962_v51 = vsel %vm1961_vm11, %v1960_v37, 0  ;;  %vm1799_vm0 = vc.u32 %v3783_v39, %v3776_v33 }
 0x2b3   :  { %v1964_v22 = vand.u32 31, %v1962_v51  ;;  %v3799_v54 = vshll.u32 %v1958_v57, 8  ;;  %v687_v44 = vsel %vm2847_vm3, 0, %v2952_v26  ;;  %v1919_v0 = vshll.u32 %v3742_v2, %v1917_v27 }
 0x2b4   :  { %v1920_v45 = vshrl.u32 %v1902_v29, %v1918_v63  ;;  %v1923_v58 = vadd.s32 127, %v1922_v24  ;;  %v1801_v11 = vsel %vm1799_vm0, %v1800_v14, %v3777_v31  ;;  %v1963_v55 = vshrl.u32 %v1962_v51, 5 }
 0x2b5   :  { %v1802_v23 = vadd.s32 %v1801_v11, %v1797_v60  ;;  %v1965_v8 = vsub.s32 32, %v1964_v22  ;;  %v1967_v43 = vshll.u32 %v4301_v6, %v1964_v22  ;;  %v1970_v20 = vshll.u32 %v4314_v41, %v1964_v22 }
 0x2b6   :  { %v1921_v1 = vor.u32 %v1920_v45, %v1919_v0  ;;  %v1924_v19 = vshll.u32 %v1923_v58, 23  ;;  %v1973_v12 = vshll.u32 %v4315_v50, %v1964_v22  ;;  %v1976_v29 = vshll.u32 %v4289_v30, %v1964_v22 }
 0x2b7   :  { %v1803_v57 = vadd.s32 536870912, %v1802_v23  ;;  %v1968_v37 = vshrl.u32 %v4314_v41, %v1965_v8  ;;  %v1971_v2 = vshrl.u32 %v4315_v50, %v1965_v8  ;;  %v4381_v31 = vand.u32 2147483647, %v3465_v17 }
 0x2b8   :  { %v1925_v27 = vor.u32 4788187, %v1924_v19  ;;  %v1928_v14 = vcvt.s32.f32 %v1921_v1  ;;  %v1974_v63 = vshrl.u32 %v4289_v30, %v1965_v8  ;;  %v1977_v24 = vshrl.u32 %v4295_v42, %v1965_v8 }
 0x2b9   :  { %vm3814_vm1 = vcmp.le.f32.partialorder %v4381_v31, 0.7853982  ;;  %v3820_v51 = vshrl.u32 %v1803_v57, 30  ;;  %v1969_v0 = vor.u32 %v1968_v37, %v1967_v43  ;;  %v1972_v41 = vor.u32 %v1971_v2, %v1970_v20 }
 0x2ba   :  { %v1979_v50 = vshll.u32 %v4295_v42, %v1964_v22  ;;  %v1926_v45 = vand.u32 2147483647, %v1925_v27  ;;  %v1975_v58 = vor.u32 %v1974_v63, %v1973_v12  ;;  %v1978_v11 = vor.u32 %v1977_v24, %v1976_v29  ;;  %v3824_v36 = vpop.eup %2348 }
 0x2bb   :  { %v1980_v31 = vshrl.u32 %v4296_v48, %v1965_v8  ;;  %v3827_v19 = vadd.s32 %v3776_v33, %v3783_v39  ;;  %v1805_v30 = vshll.u32 %v3820_v51, 30  ;;  %v1966_v1 = vshrl.u32 %v4301_v6, %v1965_v8 }
 0x2bc   :  { %vm1982_vm8 = vcmp.lt.s32.totalorder %v1963_v55, 1  ;;  %v1929_v57 = vmul.f32 %v1928_v14, %v1926_v45  ;;  %vm1983_vm5 = vcmp.lt.s32.totalorder %v1963_v55, 2  ;;  %vm1985_vm11 = vcmp.lt.s32.totalorder %v1963_v55, 4  ;;  %v3831_v42 = vpop.eup %2350 }
 0x2bd   :  { %v1981_v43 = vor.u32 %v1980_v31, %v1979_v50  ;;  %v3833_v22 = vsub.s32 %v1802_v23, %v1805_v30  ;;  %vm1984_vm0 = vcmp.lt.s32.totalorder %v1963_v55, 3  ;;  %v1986_v48 = vsel %vm1982_vm8, %v1966_v1, %v1969_v0 }
 0x2be   :  { %v1987_v20 = vsel %vm1985_vm11, %v1975_v58, 2102212464  ;;  %v1930_v33 = vxor.u32 2147483648, %v1929_v57  ;;  %v1990_v12 = vsel %vm1982_vm8, %v1969_v0, %v1972_v41  ;;  %v1991_v6 = vsel %vm1985_vm11, %v1978_v11, 920167782 }
 0x2bf   :  { %v1988_v39 = vsel %vm1984_vm0, %v1972_v41, %v1987_v20  ;;  %vm482_vm14 = vweird.f32 %v2582_v13  ;;  %v1808_v8 = vsub.s32 0, %v3833_v22  ;;  %v1992_v23 = vsel %vm1984_vm0, %v1975_v58, %v1991_v6 }
 0x2c0   :  { %v1989_v37 = vsel %vm1983_vm5, %v1986_v48, %v1988_v39  ;;  %v1994_v2 = vsel %vm1982_vm8, %v1972_v41, %v1975_v58  ;;  %vm4384_vm10 = vcmp.lt.s32.totalorder %v3465_v17, 0  ;;  %v1993_v27 = vsel %vm1983_vm5, %v1990_v12, %v1992_v23 }
 0x2c1   :  { %v1931_v29 = vsel %vm4384_vm10, %v1930_v33, %v1929_v57  ;;  %v1995_v14 = vsel %vm1985_vm11, %v1981_v43, 1326507024  ;;  %vm485_vm9 = vcmp.lt.s32.totalorder %v3795_v52, 2  ;;  %v2209_v24 = vmin.u32 %v1808_v8, %v3833_v22 }
 0x2c2   :  { %v1934_v63 = vsel %vm3814_vm1, %v3465_v17, %v1931_v29  ;;  %v1828_v0 = vsub.s32 4, %v3820_v51  ;;  %v1996_v50 = vsel %vm1984_vm0, %v1978_v11, %v1995_v14  ;;  %v2005_v31 = vmul.u32 %v3799_v54, %v1989_v37 }
 0x2c3   :  { %v1997_v41 = vsel %vm1983_vm5, %v1994_v2, %v1996_v50  ;;  %v3858_v45 = vmul.u32.u64.low %v3799_v54, %v1993_v27  ;;  %v3859_v58 = vmul.u32.u64.high %v3799_v54, %v1993_v27, %v3858_v45  ;;  %v1810_v30 = vclz %v2209_v24 }
 0x2c4   :  { %v3863_v1 = vmul.u32.u64.low %v3799_v54, %v1997_v41  ;;  %v3864_v57 = vmul.u32.u64.high %v3799_v54, %v1997_v41, %v3863_v1  ;;  %vm486_vm10 = vcmp.eq.s32.totalorder %v3795_v52, 0  ;;  %2352 = vcosq.f32 %v1934_v63 }
 0x2c5   :  { %v4385_v43 = vxor.u32 2147483648, %v2912_v32  ;;  %vm489_vm8 = vcmp.eq.s32.totalorder %v3795_v52, 2  ;;  %v691_v55 = vadd.s32 3, %v687_v44  ;;  %vm1744_vm5 = vcmp.lt.s32.totalorder %v3561_v21, 0  ;;  %v4388_v52 = vld [vmem:[#allocation2_spill] sm:$0xff] }
 0x2c6   :  { %v2210_v48 = vadd.s32 4294967294, %v1810_v30  ;;  %v4386_v54 = vxor.u32 2147483648, %v2907_v47  ;;  %v695_v33 = vxor.u32 2147483648, %v3000_v46  ;;  %v698_v39 = vxor.u32 2147483648, %v2993_v34  ;;  %v4389_v30 = vld [vmem:[#allocation11_spill] sm:$0xff] }
 0x2c7   :  { %v488_v11 = vsel %vm486_vm10, %v2907_v47, %v4385_v43  ;;  %v2008_v12 = vadd.s32 1, %v3859_v58  ;;  %v692_v18 = vand.u32 3, %v691_v55  ;;  %v583_v44 = vsel %vm2916_vm12, 0, %v2968_v10 }
 0x2c8   :  { %v491_v20 = vsel %vm489_vm8, %v4386_v54, %v2912_v32  ;;  %vm2211_vm3 = vcmp.lt.s32.totalorder %v2210_v48, 0  ;;  %v3888_v8 = vadd.s32 %v3858_v45, %v3864_v57  ;;  %vm2007_vm11 = vc.u32 %v3864_v57, %v3858_v45  ;;  %v4390_v57 = vld [vmem:[#allocation10_spill] sm:$0xff] }
 0x2c9   :  { %v492_v6 = vsel %vm485_vm9, %v488_v11, %v491_v20  ;;  %v1813_v47 = vsel %vm2211_vm3, 0, %v2210_v48  ;;  %v2009_v37 = vsel %vm2007_vm11, %v2008_v12, %v3859_v58  ;;  %vm690_vm9 = vweird.f32 %v4388_v52 }
 0x2ca   :  { %v493_v32 = vsel %vm482_vm14, nan, %v492_v6  ;;  %vm693_vm0 = vcmp.lt.s32.totalorder %v692_v18, 2  ;;  %v1814_v23 = vsub.s32 32, %v1813_v47  ;;  %v1818_v10 = vsub.s32 4294967266, %v1813_v47 }
 0x2cb   :  { %2070 = vrot.lane.b32.xlu1 %v493_v32, %s2390_s16  ;;  %v2010_v2 = vadd.s32 %v2009_v37, %v2005_v31  ;;  %vm694_vm12 = vcmp.eq.s32.totalorder %v692_v18, 0  ;;  %v1815_v29 = vshll.u32 %v3833_v22, %v1813_v47  ;;  %vm697_vm10 = vcmp.eq.s32.totalorder %v692_v18, 2  ;;  %v4392_v22 = vld [vmem:[#allocation12_spill] sm:$0xff] }
 0x2cc   :  { %v696_v27 = vsel %vm694_vm12, %v2993_v34, %v695_v33  ;;  %v587_v13 = vadd.s32 3, %v583_v44  ;;  %v1816_v14 = vshrl.u32 %v3827_v19, %v1814_v23  ;;  %v1819_v24 = vadd.s32 127, %v1818_v10  ;;  %v4397_v23 = vld [vmem:[#allocation17_spill] sm:$0xff] }
 0x2cd   :  { %v2011_v50 = vadd.s32 536870912, %v2010_v2  ;;  %v699_v41 = vsel %vm697_vm10, %v698_v39, %v3000_v46  ;;  %v591_v1 = vxor.u32 2147483648, %v4389_v30  ;;  %v594_v43 = vxor.u32 2147483648, %v4390_v57  ;;  %v4391_v46 = vld [vmem:[#allocation3_spill] sm:$0xff] }
 0x2ce   :  { %v700_v45 = vsel %vm693_vm0, %v696_v27, %v699_v41  ;;  %v588_v58 = vand.u32 3, %v587_v13  ;;  %v1817_v31 = vor.u32 %v1816_v14, %v1815_v29  ;;  %v1820_v11 = vshll.u32 %v1819_v24, 23  ;;  %v4398_v13 = vld [vmem:[#allocation4_spill] sm:$0xff] }
 0x2cf   :  { %v3902_v55 = vshrl.u32 %v2011_v50, 30  ;;  %v701_v34 = vsel %vm690_vm9, nan, %v700_v45  ;;  %2354 = vsinq.f32 %v1934_v63  ;;  %v3909_v19 = vsel %vm1744_vm5, %v1828_v0, %v3820_v51  ;;  %v4399_v14 = vld [vmem:[#allocation16_spill] sm:$0xff] }
 0x2d0   :  { %2074 = vrot.lane.b32.xlu1 %v701_v34, %s2390_s16  ;;  %vm586_vm14 = vweird.f32 %v4391_v46  ;;  %v895_v54 = vsel %vm3004_vm15, 0, %v4392_v22  ;;  %v4394_v20 = vand.u32 2147483647, %v3561_v21  ;;  %v1821_v63 = vor.u32 4788187, %v1820_v11  ;;  %v4402_v11 = vld [vmem:[#allocation19_spill] sm:$0xff] }
 0x2d1   :  { %v2013_v39 = vshll.u32 %v3902_v55, 30  ;;  %vm590_vm3 = vcmp.eq.s32.totalorder %v588_v58, 0  ;;  %vm593_vm11 = vcmp.eq.s32.totalorder %v588_v58, 2  ;;  %vm589_vm9 = vcmp.lt.s32.totalorder %v588_v58, 2  ;;  %v3925_v6 = vpop.eup %2352 }
 0x2d2   :  { %vm3918_vm8 = vcmp.le.f32.partialorder %v4394_v20, 0.7853982  ;;  %v592_v51 = vsel %vm590_vm3, %v4390_v57, %v591_v1  ;;  %v595_v0 = vsel %vm593_vm11, %v594_v43, %v4389_v30  ;;  %v899_v12 = vadd.s32 3, %v895_v54  ;;  %v4401_v43 = vld [vmem:[#allocation22_spill] sm:$0xff] }
 0x2d3   :  { %v1822_v18 = vand.u32 2147483647, %v1821_v63  ;;  %v1824_v26 = vcvt.s32.f32 %v1817_v31  ;;  %v3927_v44 = vsub.s32 %v2010_v2, %v2013_v39  ;;  %v596_v32 = vsel %vm589_vm9, %v592_v51, %v595_v0 }
 0x2d4   :  { %v597_v47 = vsel %vm586_vm14, nan, %v596_v32  ;;  %v900_v37 = vand.u32 3, %v899_v12  ;;  %v903_v52 = vxor.u32 2147483648, %v3158_v38  ;;  %v906_v10 = vxor.u32 2147483648, %v4397_v23 }
 0x2d5   :  { %v1825_v29 = vmul.f32 %v1824_v26, %v1822_v18  ;;  %v2016_v27 = vsub.s32 0, %v3927_v44  ;;  %2072 = vrot.lane.b32.xlu0 %v597_v47, %s2390_s16  ;;  %vm898_vm15 = vweird.f32 %v4398_v13  ;;  %v791_v2 = vsel %vm3065_vm6, 0, %v4399_v14  ;;  %v4405_v47 = vld [vmem:[#allocation24_spill] sm:$0xff] }
 0x2d6   :  { %vm901_vm0 = vcmp.lt.s32.totalorder %v900_v37, 2  ;;  %vm902_vm12 = vcmp.eq.s32.totalorder %v900_v37, 0  ;;  %vm905_vm10 = vcmp.eq.s32.totalorder %v900_v37, 2  ;;  %v795_v50 = vadd.s32 3, %v791_v2 }
 0x2d7   :  { %v1826_v41 = vxor.u32 2147483648, %v1825_v29  ;;  %v2217_v45 = vmin.u32 %v2016_v27, %v3927_v44  ;;  %v904_v58 = vsel %vm902_vm12, %v4397_v23, %v903_v52  ;;  %v907_v30 = vsel %vm905_vm10, %v906_v10, %v3158_v38  ;;  %v4406_v52 = vld [vmem:[#allocation23_spill] sm:$0xff] }
 0x2d8   :  { %v908_v1 = vsel %vm901_vm0, %v904_v58, %v907_v30  ;;  %v796_v57 = vand.u32 3, %v795_v50  ;;  %v799_v31 = vxor.u32 2147483648, %v4401_v43  ;;  %v802_v34 = vxor.u32 2147483648, %v4402_v11 }
 0x2d9   :  { %v1827_v46 = vsel %vm1744_vm5, %v1826_v41, %v1825_v29  ;;  %v2018_v22 = vclz %v2217_v45  ;;  %v909_v48 = vsel %vm898_vm15, nan, %v908_v1  ;;  %v1103_v20 = vsel %vm3140_vm4, 0, %v3274_v15  ;;  %v4404_v15 = vld [vmem:[#allocation5_spill] sm:$0xff] }
 0x2da   :  { %v3954_v38 = vsel %vm3918_vm8, %v3561_v21, %v1827_v46  ;;  %v2036_v63 = vsub.s32 4, %v3902_v55  ;;  %2078 = vrot.lane.b32.xlu1 %v909_v48, %s2390_s16  ;;  %vm798_vm6 = vcmp.eq.s32.totalorder %v796_v57, 0  ;;  %vm801_vm14 = vcmp.eq.s32.totalorder %v796_v57, 2  ;;  %v4410_v48 = vld [vmem:[#allocation6_spill] sm:$0xff] }
 0x2db   :  { %v2218_v39 = vadd.s32 4294967294, %v2018_v22  ;;  %vm797_vm5 = vcmp.lt.s32.totalorder %v796_v57, 2  ;;  %v800_v51 = vsel %vm798_vm6, %v4402_v11, %v799_v31  ;;  %v803_v0 = vsel %vm801_vm14, %v802_v34, %v4401_v43  ;;  %v4408_v31 = vld [vmem:[#allocation26_spill] sm:$0xff] }
 0x2dc   :  { %2356 = vcosq.f32 %v3954_v38  ;;  %vm794_vm4 = vweird.f32 %v4404_v15  ;;  %v804_v12 = vsel %vm797_vm5, %v800_v51, %v803_v0  ;;  %v1107_v18 = vadd.s32 3, %v1103_v20  ;;  %v3962_v26 = vpop.eup %2354 }
 0x2dd   :  { %vm2219_vm3 = vcmp.lt.s32.totalorder %v2218_v39, 0  ;;  %v805_v32 = vsel %vm794_vm4, nan, %v804_v12  ;;  %v1111_v37 = vxor.u32 2147483648, %v4405_v47  ;;  %v1114_v23 = vxor.u32 2147483648, %v4406_v52 }
 0x2de   :  { %v2021_v10 = vsel %vm2219_vm3, 0, %v2218_v39  ;;  %2076 = vrot.lane.b32.xlu0 %v805_v32, %s2390_s16  ;;  %vm1106_vm11 = vweird.f32 %v2805_v40  ;;  %v1108_v29 = vand.u32 3, %v1107_v18  ;;  %v999_v13 = vsel %vm3173_vm13, 0, %v3287_v5  ;;  %v4415_v18 = vld [vmem:[#allocation32_spill] sm:$0xff] }
 0x2df   :  { %v2022_v14 = vsub.s32 32, %v2021_v10  ;;  %v2023_v24 = vshll.u32 %v3927_v44, %v2021_v10  ;;  %v2026_v2 = vsub.s32 4294967266, %v2021_v10  ;;  %v1003_v50 = vadd.s32 3, %v999_v13  ;;  %v4423_v44 = vld [vmem:[#allocation13_spill] sm:$0xff] }
 0x2e0   :  { %vm1109_vm9 = vcmp.lt.s32.totalorder %v1108_v29, 2  ;;  %vm1110_vm15 = vcmp.eq.s32.totalorder %v1108_v29, 0  ;;  %vm1113_vm0 = vcmp.eq.s32.totalorder %v1108_v29, 2  ;;  %v1007_v41 = vxor.u32 2147483648, %v3339_v28  ;;  %v4417_v29 = vld [vmem:[#allocation29_spill] sm:$0xff] }
 0x2e1   :  { %v2024_v45 = vshrl.u32 %v3888_v8, %v2022_v14  ;;  %v2027_v58 = vadd.s32 127, %v2026_v2  ;;  %v1112_v30 = vsel %vm1110_vm15, %v4406_v52, %v1111_v37  ;;  %v1115_v1 = vsel %vm1113_vm0, %v1114_v23, %v4405_v47  ;;  %v4411_v8 = vld [vmem:[#allocation8_spill] sm:$0xff]  ;;  %v4416_v47 = vld [vmem:[#allocation31_spill] sm:$0xff] }
 0x2e2   :  { %v1116_v57 = vsel %vm1109_vm9, %v1112_v30, %v1115_v1  ;;  %v1004_v43 = vand.u32 3, %v1003_v50  ;;  %v1010_v5 = vxor.u32 2147483648, %v3332_v35  ;;  %v1311_v11 = vsel %vm3261_vm7, 0, %v4408_v31  ;;  %v4420_v1 = vld [vmem:[#allocation30_spill] sm:$0xff] }
 0x2e3   :  { %v2025_v34 = vor.u32 %v2024_v45, %v2023_v24  ;;  %v2028_v46 = vshll.u32 %v2027_v58, 23  ;;  %v1117_v22 = vsel %vm1106_vm11, nan, %v1116_v57  ;;  %vm1002_vm13 = vweird.f32 %v4410_v48  ;;  %v4419_v58 = vld [vmem:[#allocation34_spill] sm:$0xff]  ;;  %v4421_v57 = vld [vmem:[#allocation33_spill] sm:$0xff] }
 0x2e4   :  { %vm1952_vm12 = vcmp.lt.s32.totalorder %v3606_v25, 0  ;;  %2082 = vrot.lane.b32.xlu1 %v1117_v22, %s2390_s16  ;;  %vm1006_vm10 = vcmp.eq.s32.totalorder %v1004_v43, 0  ;;  %vm1009_vm6 = vcmp.eq.s32.totalorder %v1004_v43, 2  ;;  %vm1314_vm14 = vweird.f32 %v4411_v8 }
 0x2e5   :  { %v1315_v54 = vadd.s32 3, %v1311_v11  ;;  %v4412_v20 = vand.u32 2147483647, %v3606_v25  ;;  %v2029_v51 = vor.u32 4788187, %v2028_v46  ;;  %vm1005_vm7 = vcmp.lt.s32.totalorder %v1004_v43, 2 }
 0x2e6   :  { %v1008_v40 = vsel %vm1006_vm10, %v3332_v35, %v1007_v41  ;;  %v1011_v0 = vsel %vm1009_vm6, %v1010_v5, %v3339_v28  ;;  %v1319_v32 = vxor.u32 2147483648, %v4415_v18  ;;  %v1322_v37 = vxor.u32 2147483648, %v4416_v47 }
 0x2e7   :  { %vm3988_vm5 = vcmp.le.f32.partialorder %v4412_v20, 0.7853982  ;;  %v1012_v15 = vsel %vm1005_vm7, %v1008_v40, %v1011_v0  ;;  %v1316_v12 = vand.u32 3, %v1315_v54  ;;  %v2030_v52 = vand.u32 2147483647, %v2029_v51  ;;  %v4424_v51 = vld [vmem:[#allocation36_spill] sm:$0xff] }
 0x2e8   :  { %v2032_v23 = vcvt.s32.f32 %v2025_v34  ;;  %v1013_v10 = vsel %vm1002_vm13, nan, %v1012_v15  ;;  %v1207_v13 = vsel %vm3346_vm2, 0, %v4417_v29  ;;  %v1215_v50 = vxor.u32 2147483648, %v3521_v9  ;;  %v4425_v0 = vld [vmem:[#allocation37_spill] sm:$0xff]  ;;  %v4426_v15 = vld [vmem:[#allocation35_spill] sm:$0xff] }
 0x2e9   :  { %2080 = vrot.lane.b32.xlu0 %v1013_v10, %s2390_s16  ;;  %vm1317_vm4 = vcmp.lt.s32.totalorder %v1316_v12, 2  ;;  %vm1318_vm3 = vcmp.eq.s32.totalorder %v1316_v12, 0  ;;  %vm1321_vm11 = vcmp.eq.s32.totalorder %v1316_v12, 2  ;;  %v1211_v28 = vadd.s32 3, %v1207_v13  ;;  %v4002_v35 = vpop.eup %2356 }
 0x2ea   :  { %v2033_v14 = vmul.f32 %v2032_v23, %v2030_v52  ;;  %v1320_v24 = vsel %vm1318_vm3, %v4416_v47, %v1319_v32  ;;  %v1323_v2 = vsel %vm1321_vm11, %v1322_v37, %v4415_v18  ;;  %v1218_v30 = vxor.u32 2147483648, %v4419_v58  ;;  %v4428_v32 = vld [vmem:[#allocation14_spill] sm:$0xff]  ;;  %v4429_v37 = vld [vmem:[#allocation21_spill] sm:$0xff] }
 0x2eb   :  { %v1324_v41 = vsel %vm1317_vm4, %v1320_v24, %v1323_v2  ;;  %v1212_v45 = vand.u32 3, %v1211_v28  ;;  %vm4422_vm2 = vnez %v4421_v57  ;;  %vm1210_vm9 = vweird.f32 %v4423_v44  ;;  %v4431_v24 = vld [vmem:[#allocation38_spill] sm:$0xff] }
 0x2ec   :  { %v1519_v43 = vsel %vm4422_vm2, 0, %v4420_v1  ;;  %v2034_v5 = vxor.u32 2147483648, %v2033_v14  ;;  %v1325_v31 = vsel %vm1314_vm14, nan, %v1324_v41  ;;  %v1527_v34 = vxor.u32 2147483648, %v3631_v59 }
 0x2ed   :  { %v1523_v11 = vadd.s32 3, %v1519_v43  ;;  %2086 = vrot.lane.b32.xlu1 %v1325_v31, %s2390_s16  ;;  %vm1213_vm15 = vcmp.lt.s32.totalorder %v1212_v45, 2  ;;  %vm1214_vm0 = vcmp.eq.s32.totalorder %v1212_v45, 0  ;;  %vm1217_vm13 = vcmp.eq.s32.totalorder %v1212_v45, 2 }
 0x2ee   :  { %v2035_v46 = vsel %vm1952_vm12, %v2034_v5, %v2033_v14  ;;  %v1216_v22 = vsel %vm1214_vm0, %v4419_v58, %v1215_v50  ;;  %v1219_v48 = vsel %vm1217_vm13, %v1218_v30, %v3521_v9  ;;  %v1530_v40 = vxor.u32 2147483648, %v4424_v51 }
 0x2ef   :  { %v1524_v54 = vand.u32 3, %v1523_v11  ;;  %v2038_v8 = vsel %vm3988_vm5, %v3606_v25, %v2035_v46  ;;  %v1220_v20 = vsel %vm1213_vm15, %v1216_v22, %v1219_v48  ;;  %vm4427_vm10 = vnez %v4426_v15 }
 0x2f0   :  { %v1415_v12 = vsel %vm4427_vm10, 0, %v4425_v0  ;;  %2358 = vsinq.f32 %v3954_v38  ;;  %v1221_v18 = vsel %vm1210_vm9, nan, %v1220_v20  ;;  %vm1522_vm6 = vweird.f32 %v4428_v32 }
 0x2f1   :  { %vm1526_vm14 = vcmp.eq.s32.totalorder %v1524_v54, 0  ;;  %2360 = vcosq.f32 %v2038_v8  ;;  %2084 = vrot.lane.b32.xlu0 %v1221_v18, %s2390_s16  ;;  %vm1525_vm7 = vcmp.lt.s32.totalorder %v1524_v54, 2  ;;  %vm1529_vm4 = vcmp.eq.s32.totalorder %v1524_v54, 2 }
 0x2f2   :  { %v1528_v9 = vsel %vm1526_vm14, %v4424_v51, %v1527_v34  ;;  %2362 = vsinq.f32 %v2038_v8  ;;  %v1531_v47 = vsel %vm1529_vm4, %v1530_v40, %v3631_v59  ;;  %vm1418_vm3 = vweird.f32 %v4429_v37 }
 0x2f3   :  { %v1419_v52 = vadd.s32 3, %v1415_v12  ;;  %v1532_v38 = vsel %vm1525_vm7, %v1528_v9, %v1531_v47  ;;  %v1423_v23 = vxor.u32 2147483648, %v3740_v3  ;;  %v1426_v10 = vxor.u32 2147483648, %v3645_v16 }
 0x2f4   :  { %vm4430_vm11 = vnez %v4368_v4  ;;  %v1533_v27 = vsel %vm1522_vm6, nan, %v1532_v38  ;;  %v1735_v14 = vxor.u32 2147483648, %v3750_v53  ;;  %v1738_v59 = vxor.u32 2147483648, %v3745_v61 }
 0x2f5   :  { %v1727_v29 = vsel %vm4430_vm11, 0, %v3689_v62  ;;  %v1420_v13 = vand.u32 3, %v1419_v52  ;;  %2090 = vrot.lane.b32.xlu1 %v1533_v27, %s2390_s16  ;;  %vm4432_vm2 = vnez %v4378_v56  ;;  %v1631_v50 = vxor.u32 2147483648, %v3831_v42 }
 0x2f6   :  { %v1731_v28 = vadd.s32 3, %v1727_v29  ;;  %v1623_v2 = vsel %vm4432_vm2, 0, %v4431_v24  ;;  %v1634_v41 = vxor.u32 2147483648, %v3824_v36  ;;  %v1935_v30 = vsel %vm3814_vm1, 0, %v3790_v7  ;;  %v2366_v29 = vld [vmem:[%s4214_s0 + $0x8] sm:$0xff]  ;;  %v2368_v24 = vld [vmem:[%s4214_s0 + $0x18] sm:$0xff] }
 0x2f7   :  { %vm1421_vm9 = vcmp.lt.s32.totalorder %v1420_v13, 2  ;;  %vm1422_vm15 = vcmp.eq.s32.totalorder %v1420_v13, 0  ;;  %vm1425_vm0 = vcmp.eq.s32.totalorder %v1420_v13, 2  ;;  %v1627_v58 = vadd.s32 3, %v1623_v2 }
 0x2f8   :  { %v1732_v4 = vand.u32 3, %v1731_v28  ;;  %v1424_v62 = vsel %vm1422_vm15, %v3645_v16, %v1423_v23  ;;  %v1427_v45 = vsel %vm1425_vm0, %v1426_v10, %v3740_v3  ;;  %v4433_v16 = vld [vmem:[#allocation27_spill] sm:$0xff]  ;;  %v1939_v31 = vadd.s32 3, %v1935_v30  ;;  %v2367_v28 = vld [vmem:[%s4214_s0 + $0x20] sm:$0xff] }
 0x2f9   :  { %v1428_v1 = vsel %vm1421_vm9, %v1424_v62, %v1427_v45  ;;  %v1628_v5 = vand.u32 3, %v1627_v58  ;;  %vm1730_vm14 = vweird.f32 %v4433_v16  ;;  %v1943_v7 = vxor.u32 2147483648, %v3962_v26  ;;  %v2370_v45 = vld [vmem:[%s4214_s0 + $0x28] sm:$0xff] }
 0x2fa   :  { %vm1733_vm13 = vcmp.lt.s32.totalorder %v1732_v4, 2  ;;  %vm1734_vm10 = vcmp.eq.s32.totalorder %v1732_v4, 0  ;;  %vm1737_vm6 = vcmp.eq.s32.totalorder %v1732_v4, 2  ;;  %v1429_v56 = vsel %vm1418_vm3, nan, %v1428_v1  ;;  %v2371_v1 = vld [vmem:[%s4214_s0 + $0x40] sm:$0xff] }
 0x2fb   :  { %v1736_v57 = vsel %vm1734_vm10, %v3745_v61, %v1735_v14  ;;  %v1739_v43 = vsel %vm1737_vm6, %v1738_v59, %v3750_v53  ;;  %2088 = vrot.lane.b32.xlu0 %v1429_v56, %s2390_s16  ;;  %vm1629_vm1 = vcmp.lt.s32.totalorder %v1628_v5, 2  ;;  %vm1630_vm7 = vcmp.eq.s32.totalorder %v1628_v5, 0 }
 0x2fc   :  { %v1740_v3 = vsel %vm1733_vm13, %v1736_v57, %v1739_v43  ;;  %vm1633_vm4 = vcmp.eq.s32.totalorder %v1628_v5, 2  ;;  %v1632_v44 = vsel %vm1630_vm7, %v3824_v36, %v1631_v50  ;;  %v1940_v53 = vand.u32 3, %v1939_v31  ;;  %v2372_v43 = vld [vmem:[%s4214_s0 + $0x38] sm:$0xff] }
 0x2fd   :  { %v1741_v60 = vsel %vm1730_vm14, nan, %v1740_v3  ;;  %v1635_v61 = vsel %vm1633_vm4, %v1634_v41, %v3831_v42  ;;  %v1946_v11 = vxor.u32 2147483648, %v3925_v6  ;;  %v2359_v34 = vpop.eup %2358  ;;  %v2037_v46 = vsel %vm1952_vm12, %v2036_v63, %v3902_v55  ;;  %v2369_v41 = vld [vmem:[%s4214_s0 + $0x30] sm:$0xff] }
 0x2fe   :  { %2094 = vrot.lane.b32.xlu1 %v1741_v60, %s2390_s16  ;;  %vm1626_vm3 = vweird.f32 %v3311_v49  ;;  %v1636_v22 = vsel %vm1629_vm1, %v1632_v44, %v1635_v61  ;;  %v1831_v48 = vsel %vm3918_vm8, 0, %v3909_v19  ;;  %v2361_v36 = vpop.eup %2360  ;;  %vm1938_vm11 = vweird.f32 %v3465_v17  ;;  %v2373_v3 = vld [vmem:[%s4214_s0 + $0x50] sm:$0xff]  ;;  %v2374_v60 = vld [vmem:[%s4214_s0 + $0x48] sm:$0xff] }
 0x2ff   :  { %v1637_v54 = vsel %vm1626_vm3, nan, %v1636_v22  ;;  %vm1942_vm2 = vcmp.eq.s32.totalorder %v1940_v53, 0  ;;  %vm1945_vm9 = vcmp.eq.s32.totalorder %v1940_v53, 2  ;;  %v2363_v42 = vpop.eup %2362  ;;  %vm1941_vm15 = vcmp.lt.s32.totalorder %v1940_v53, 2  ;;  %v2375_v53 = vld [vmem:[%s4214_s0 + $0x60] sm:$0xff] }
 0x300   :  { %2092 = vrot.lane.b32.xlu0 %v1637_v54, %s2390_s16  ;;  %v1944_v8 = vsel %vm1942_vm2, %v3925_v6, %v1943_v7  ;;  %v1947_v55 = vsel %vm1945_vm9, %v1946_v11, %v3962_v26  ;;  %v1835_v49 = vadd.s32 3, %v1831_v48  ;;  %v1839_v20 = vxor.u32 2147483648, %v2359_v34 }
 0x301   :  { %v1948_v63 = vsel %vm1941_vm15, %v1944_v8, %v1947_v55  ;;  %v1842_v33 = vxor.u32 2147483648, %v4002_v35  ;;  %v2039_v19 = vsel %vm3988_vm5, 0, %v2037_v46  ;;  %v2047_v0 = vxor.u32 2147483648, %v2363_v42  ;;  %v2376_v46 = vld [vmem:[%s4214_s0 + $0x58] sm:$0xff]  ;;  %v2378_v8 = vld [vmem:[%s4214_s0 + $0x68] sm:$0xff] }
 0x302   :  { %v1949_v51 = vsel %vm1938_vm11, nan, %v1948_v63  ;;  %v1836_v17 = vand.u32 3, %v1835_v49  ;;  %v2043_v40 = vadd.s32 3, %v2039_v19  ;;  %v2050_v15 = vxor.u32 2147483648, %v2361_v36  ;;  %v2379_v63 = vld [vmem:[%s4214_s0 + $0x78] sm:$0xff] }
 0x303   :  { %2098 = vrot.lane.b32.xlu1 %v1949_v51, %s2390_s16  ;;  %vm1834_vm13 = vweird.f32 %v3561_v21  ;;  %vm2042_vm14 = vweird.f32 %v3606_v25  ;;  %vm2118_vm1 = vcmask 15360   ;;  %vm2135_vm7 = vcmask 211968   ;;  %v2364_v21 = vld [vmem:[%s4214_s0] sm:$0xff]  ;;  %v2365_v25 = vld [vmem:[%s4214_s0 + $0x10] sm:$0xff] }
 0x304   :  { %vm1838_vm8 = vcmp.eq.s32.totalorder %v1836_v17, 0  ;;  %vm1841_vm12 = vcmp.eq.s32.totalorder %v1836_v17, 2  ;;  %v2044_v6 = vand.u32 3, %v2043_v40  ;;  %vm1837_vm0 = vcmp.lt.s32.totalorder %v1836_v17, 2 }
 0x305   :  { %v1840_v26 = vsel %vm1838_vm8, %v4002_v35, %v1839_v20  ;;  %v1843_v12 = vsel %vm1841_vm12, %v1842_v33, %v2359_v34 }
 0x306   :  { %v1844_v18 = vsel %vm1837_vm0, %v1840_v26, %v1843_v12  ;;  %vm2046_vm10 = vcmp.eq.s32.totalorder %v2044_v6, 0  ;;  %vm2049_vm6 = vcmp.eq.s32.totalorder %v2044_v6, 2  ;;  %vm2045_vm5 = vcmp.lt.s32.totalorder %v2044_v6, 2 }
 0x307   :  { %v1845_v39 = vsel %vm1834_vm13, nan, %v1844_v18  ;;  %v2048_v32 = vsel %vm2046_vm10, %v2361_v36, %v2047_v0  ;;  %v2051_v9 = vsel %vm2049_vm6, %v2050_v15, %v2363_v42  ;;  %v2377_v36 = vld [vmem:[%s4214_s0 + $0x70] sm:$0xff] }
 0x308   :  { %2096 = vrot.lane.b32.xlu0 %v1845_v39, %s2390_s16  ;;  %v2052_v47 = vsel %vm2045_vm5, %v2048_v32, %v2051_v9 }
 0x309   :  { %v2053_v37 = vsel %vm2042_vm14, nan, %v2052_v47 }
 0x30c   :  { %2100 = vrot.lane.b32.xlu0 %v2053_v37, %s2390_s16 }
 0x33d   :  { %v2071_v35 = vpop.permute.xlu1 %2070 }
 0x33e   :  { %v2119_v52 = vsel %vm2118_vm1, %v2364_v21, %v2071_v35 }
 0x33f   :  { %2136 = vst.msk [vmem:[%s4216_s2] sm:$0xff] %vm2135_vm7, %v2119_v52 }
 0x342   :  { %v2075_v38 = vpop.permute.xlu1 %2074 }
 0x343   :  { %v2121_v23 = vsel %vm2118_vm1, %v2365_v25, %v2075_v38 }
 0x344   :  { %2138 = vst.msk [vmem:[%s4216_s2 + $0x10] sm:$0xff] %vm2135_vm7, %v2121_v23 }
 0x347   :  { %v2073_v10 = vpop.permute.xlu0 %2072 }
 0x348   :  { %v2120_v27 = vsel %vm2118_vm1, %v2366_v29, %v2073_v10 }
 0x349   :  { %2137 = vst.msk [vmem:[%s4216_s2 + $0x8] sm:$0xff] %vm2135_vm7, %v2120_v27 }
 0x34c   :  { %v2079_v13 = vpop.permute.xlu1 %2078 }
 0x34d   :  { %v2123_v14 = vsel %vm2118_vm1, %v2367_v28, %v2079_v13 }
 0x34e   :  { %2140 = vst.msk [vmem:[%s4216_s2 + $0x20] sm:$0xff] %vm2135_vm7, %v2123_v14 }
 0x350   :  { %v2077_v59 = vpop.permute.xlu0 %2076 }
 0x351   :  { %v2122_v2 = vsel %vm2118_vm1, %v2368_v24, %v2077_v59 }
 0x352   :  { %2139 = vst.msk [vmem:[%s4216_s2 + $0x18] sm:$0xff] %vm2135_vm7, %v2122_v2 }
 0x356   :  { %v2083_v50 = vpop.permute.xlu1 %2082 }
 0x357   :  { %v2125_v4 = vsel %vm2118_vm1, %v2369_v41, %v2083_v50 }
 0x358   :  { %2142 = vst.msk [vmem:[%s4216_s2 + $0x30] sm:$0xff] %vm2135_vm7, %v2125_v4 }
 0x35b   :  { %v2081_v62 = vpop.permute.xlu0 %2080 }
 0x35c   :  { %v2124_v58 = vsel %vm2118_vm1, %v2370_v45, %v2081_v62 }
 0x35d   :  { %2141 = vst.msk [vmem:[%s4216_s2 + $0x28] sm:$0xff] %vm2135_vm7, %v2124_v58 }
 0x35f   :  { %v2087_v30 = vpop.permute.xlu1 %2086 }
 0x360   :  { %v2127_v56 = vsel %vm2118_vm1, %v2371_v1, %v2087_v30 }
 0x361   :  { %2144 = vst.msk [vmem:[%s4216_s2 + $0x40] sm:$0xff] %vm2135_vm7, %v2127_v56 }
 0x363   :  { %v2085_v57 = vpop.permute.xlu0 %2084 }
 0x364   :  { %v2126_v5 = vsel %vm2118_vm1, %v2372_v43, %v2085_v57 }
 0x365   :  { %2143 = vst.msk [vmem:[%s4216_s2 + $0x38] sm:$0xff] %vm2135_vm7, %v2126_v5 }
 0x367   :  { %v2091_v16 = vpop.permute.xlu1 %2090 }
 0x368   :  { %v2129_v31 = vsel %vm2118_vm1, %v2373_v3, %v2091_v16 }
 0x369   :  { %2146 = vst.msk [vmem:[%s4216_s2 + $0x50] sm:$0xff] %vm2135_vm7, %v2129_v31 }
 0x36d   :  { %v2089_v7 = vpop.permute.xlu0 %2088 }
 0x36e   :  { %v2128_v44 = vsel %vm2118_vm1, %v2374_v60, %v2089_v7 }
 0x36f   :  { %2145 = vst.msk [vmem:[%s4216_s2 + $0x48] sm:$0xff] %vm2135_vm7, %v2128_v44 }
 0x370   :  { %v2095_v61 = vpop.permute.xlu1 %2094 }
 0x371   :  { %v2131_v11 = vsel %vm2118_vm1, %v2375_v53, %v2095_v61 }
 0x372   :  { %2148 = vst.msk [vmem:[%s4216_s2 + $0x60] sm:$0xff] %vm2135_vm7, %v2131_v11  ;;  %v2093_v34 = vpop.permute.xlu0 %2092 }
 0x373   :  { %v2130_v22 = vsel %vm2118_vm1, %v2376_v46, %v2093_v34 }
 0x374   :  { %2147 = vst.msk [vmem:[%s4216_s2 + $0x58] sm:$0xff] %vm2135_vm7, %v2130_v22 }
 0x375   :  { %v2099_v48 = vpop.permute.xlu1 %2098 }
 0x376   :  { %v2133_v54 = vsel %vm2118_vm1, %v2377_v36, %v2099_v48 }
 0x377   :  { %2150 = vst.msk [vmem:[%s4216_s2 + $0x70] sm:$0xff] %vm2135_vm7, %v2133_v54 }
 0x37a   :  { %v2097_v42 = vpop.permute.xlu0 %2096 }
 0x37b   :  { %v2132_v55 = vsel %vm2118_vm1, %v2378_v8, %v2097_v42 }
 0x37c   :  { %2149 = vst.msk [vmem:[%s4216_s2 + $0x68] sm:$0xff] %vm2135_vm7, %v2132_v55 }
 0x37e   :  { %v2101_v49 = vpop.permute.xlu0 %2100 }
 0x37f   :  { %v2134_v20 = vsel %vm2118_vm1, %v2379_v63, %v2101_v49 }
 0x380   :  { %2151 = vst.msk [vmem:[%s4216_s2 + $0x78] sm:$0xff] %vm2135_vm7, %v2134_v20 }

</bundles_post_ra>
